<compile_context>
chip_gen: v7x
topology: tpu7x:2x2x1
jax: 0.10.0
libtpu: 0.0.40
codegen_flags: <defaults>
</compile_context>

<pallas_src>
import functools

import jax
import jax.numpy as jnp
from jax.experimental import pallas as pl
from jax.experimental.pallas import tpu as pltpu

_EXP_COEF = -10.0 / 9.0  # folds the 1/9 avg-pool scale into the exponent


# ----------------------------- Pallas kernel --------------------------------
def _smooth_kernel(ip_ref, rp_ref, out_ref):
    pi = ip_ref[...]  # (Bt, Hp, Wp) f32; data at [:, 2:H+2, 2:W+2], zeros elsewhere
    pr = rp_ref[...]

    # 2x2 cross-correlation gradients (F.conv2d, padding=1), shifted by (+1, +1)
    # w.r.t. the conv output grid.  Thanks to the 2-pixel zero halo these arrays
    # are exactly zero outside the valid (H+1, W+1) window.
    ax_i = jnp.abs(pi[:, 1:, 1:] - pi[:, 1:, :-1])  # (Bt, Hp-1, Wp-1)
    ay_i = jnp.abs(pi[:, 1:, 1:] - pi[:, :-1, 1:])
    ax_r = jnp.abs(pr[:, 1:, 1:] - pr[:, 1:, :-1])
    ay_r = jnp.abs(pr[:, 1:, 1:] - pr[:, :-1, 1:])

    def box3(a):
        # Separable 3x3 box sum (== 9 * avg_pool2d(k=3, s=1, p=1)) on the interior.
        rows = a[:, :, :-2] + a[:, :, 1:-1] + a[:, :, 2:]            # (Bt, Hp-1, Wp-3)
        return rows[:, :-2, :] + rows[:, 1:-1, :] + rows[:, 2:, :]   # (Bt, Hp-3, Wp-3)

    sx = box3(ax_r)
    sy = box3(ay_r)

    # I-gradients restricted to the same interior (aligned with sx/sy).  Outside
    # the valid window they are zero, so padded regions contribute nothing.
    term = (ax_i[:, 1:-1, 1:-1] * jnp.exp(_EXP_COEF * sx)
            + ay_i[:, 1:-1, 1:-1] * jnp.exp(_EXP_COEF * sy))

    out_ref[0, 0] = jnp.sum(term)  # per-grid-step partial (no cross-step RMW)


# ------------------------------ pallas_call ----------------------------------
def _round_up(x, m):
    return (x + m - 1) // m * m


def _choose_block_b(B, Hp, Wp, budget_bytes=24 << 20):
    # Rough live set per step: 2 inputs x 2 (double buffer) + ~10 f32 intermediates.
    per_plane = 14 * Hp * Wp * 4
    return int(max(1, min(B, budget_bytes // per_plane)))


def _pallas_smooth_sum(Ib, Rb, block_b=None):
    B, H, W = Ib.shape
    Hp = _round_up(H + 4, 8)      # 2-pixel halo top + >=2 bottom, sublane aligned
    Wp = _round_up(W + 4, 128)    # lane-dense last dim
    bt = _choose_block_b(B, Hp, Wp) if block_b is None else max(1, min(int(block_b), B))
    Bp = _round_up(B, bt)
    g = Bp // bt
    # TODO(synk): for very large H,W a single plane can exceed the VMEM budget;
    # add H-tiling with a 1-row halo instead of whole-plane blocks.

    def pad(x):
        return jnp.pad(x, ((0, Bp - B), (2, Hp - H - 2), (2, Wp - W - 2)))

    Ip = pad(Ib)
    Rp = pad(Rb)

    partials = pl.pallas_call(
        _smooth_kernel,
        out_shape=jax.ShapeDtypeStruct((g, 1), jnp.float32),
        grid=(g,),
        in_specs=[
            pl.BlockSpec((bt, Hp, Wp), lambda i: (i, 0, 0)),
            pl.BlockSpec((bt, Hp, Wp), lambda i: (i, 0, 0)),
        ],
        out_specs=pl.BlockSpec((1, 1), lambda i: (i, 0),
                               memory_space=pltpu.SMEM),
        compiler_params=pltpu.CompilerParams(
            dimension_semantics=("parallel",),
            vmem_limit_bytes=48 * 1024 * 1024),
    )(Ip, Rp)
    return jnp.sum(partials)


# ------------------------------- JAX glue ------------------------------------
def _bilinear_resize_nchw(x, out_hw):
    """F.interpolate(mode='bilinear', align_corners=False) semantics."""
    N, C, Hin, Win = x.shape
    Hout, Wout = out_hw
    if (Hin, Win) == (Hout, Wout):
        return x

    def src(out_size, in_size):
        scale = in_size / out_size
        s = (jnp.arange(out_size, dtype=jnp.float32) + 0.5) * scale - 0.5
        s = jnp.maximum(s, 0.0)
        i0 = jnp.minimum(jnp.floor(s).astype(jnp.int32), in_size - 1)
        i1 = jnp.minimum(i0 + 1, in_size - 1)
        w = jnp.clip(s - i0.astype(jnp.float32), 0.0, 1.0)
        return i0, i1, w

    h0, h1, wh = src(Hout, Hin)
    w0, w1, ww = src(Wout, Win)
    top = (x[:, :, h0, :] * (1.0 - wh)[None, None, :, None]
           + x[:, :, h1, :] * wh[None, None, :, None])
    out = top[:, :, :, w0] * (1.0 - ww) + top[:, :, :, w1] * ww
    return out


@functools.partial(jax.jit, static_argnames=("block_b",))
def smooth_loss_pallas(I, R, loss_weight=1.0, block_b=None):
    N, C, H, W = I.shape
    Rr = _bilinear_resize_nchw(R.astype(jnp.float32), (H, W))
    I = I.astype(jnp.float32)
    if C == 1:
        Ib = I.reshape(N, H, W)
        Rb = Rr.mean(axis=1)
    else:
        Ib = I.reshape(N * C, H, W)
        Rb = Rr.reshape(N * C, H, W)
    B = Ib.shape[0]
    total = _pallas_smooth_sum(Ib, Rb, block_b)
    mean = total / jnp.float32(B * (H + 1) * (W + 1))
    return mean * loss_weight


class SmoothLoss:
    """JAX/Pallas equivalent of the PyTorch SmoothLoss module (no parameters)."""

    def __init__(self, loss_weight=1.0):
        self.name = "SmoothLoss"
        self.loss_weight = loss_weight

    def __call__(self, x, y):
        return smooth_loss_pallas(x, y, self.loss_weight)


# --------------------------- pure-JAX reference -------------------------------
def _reference_smooth_loss(I, R, loss_weight=1.0):
    N, C, H, W = I.shape
    Rr = _bilinear_resize_nchw(R.astype(jnp.float32), (H, W))
    I = I.astype(jnp.float32)
    if C == 1:
        Ib = I.reshape(N, H, W)
        Rb = Rr.mean(axis=1)
    else:
        Ib = I.reshape(N * C, H, W)
        Rb = Rr.reshape(N * C, H, W)
    Ip = jnp.pad(Ib, ((0, 0), (1, 1), (1, 1)))
    Rp = jnp.pad(Rb, ((0, 0), (1, 1), (1, 1)))
    Ix = jnp.abs(Ip[:, 1:, 1:] - Ip[:, 1:, :-1])
    Iy = jnp.abs(Ip[:, 1:, 1:] - Ip[:, :-1, 1:])
    Gx = jnp.abs(Rp[:, 1:, 1:] - Rp[:, 1:, :-1])
    Gy = jnp.abs(Rp[:, 1:, 1:] - Rp[:, :-1, 1:])

    def avgpool3(x):
        s = jax.lax.reduce_window(x, 0.0, jax.lax.add, (1, 3, 3), (1, 1, 1),
                                  [(0, 0), (1, 1), (1, 1)])
        return s / 9.0

    Rx = avgpool3(Gx)
    Ry = avgpool3(Gy)
    return jnp.mean(Ix * jnp.exp(-10.0 * Rx)
                    + Iy * jnp.exp(-10.0 * Ry)) * loss_weight


if __name__ == "__main__":
    key = jax.random.PRNGKey(0)
    k1, k2 = jax.random.split(key)
    # I at full res, R at half res (exercises the bilinear-resize path); C > 1
    # exercises the view(N*C, 1, H, W) path.
    I = jax.random.uniform(k1, (2, 4, 16, 16), dtype=jnp.float32)
    R = jax.random.uniform(k2, (2, 4, 8, 8), dtype=jnp.float32)

    module = SmoothLoss(loss_weight=1.0)
    loss = jax.block_until_ready(module(I, R))
    ref = jax.block_until_ready(_reference_smooth_loss(I, R, 1.0))
    assert loss.shape == (), f"expected scalar, got {loss.shape}"
    assert jnp.allclose(loss, ref, rtol=1e-5, atol=1e-6), (loss, ref)

    # Multi-step grid + batch padding (B=8 planes, 3 per step -> grid of 3).
    loss_tiled = jax.block_until_ready(smooth_loss_pallas(I, R, 1.0, block_b=3))
    assert jnp.allclose(loss_tiled, ref, rtol=1e-5, atol=1e-6), (loss_tiled, ref)

    # C == 1 path (R channel-averaged) with a non-unit loss weight.
    I1 = jax.random.uniform(k1, (2, 1, 16, 16), dtype=jnp.float32)
    R1 = jax.random.uniform(k2, (2, 3, 16, 16), dtype=jnp.float32)
    loss1 = jax.block_until_ready(smooth_loss_pallas(I1, R1, 0.5))
    ref1 = jax.block_until_ready(_reference_smooth_loss(I1, R1, 0.5))
    assert jnp.allclose(loss1, ref1, rtol=1e-5, atol=1e-6), (loss1, ref1)

    print("KERNEL_OK")
</pallas_src>

<mosaic_0001>
module attributes {stable_mosaic.version = 11 : i64} {
  func.func @_smooth_kernel(%arg0: i32, %arg1: memref<8x24x128xf32, #tpu.memory_space<vmem>>, %arg2: memref<8x24x128xf32, #tpu.memory_space<vmem>>, %arg3: memref<1x1xf32, #tpu.memory_space<smem>>) attributes {dimension_semantics = [#tpu.dimension_semantics<parallel>], iteration_bounds = array<i64: 1>, scalar_prefetch = 0 : i64, scratch_operands = 0 : i64, tpu.core_type = #tpu.core_type<tc>, window_params = [{transform_indices = @transform_0, window_bounds = array<i64: 8, 24, 128>}, {transform_indices = @transform_1, window_bounds = array<i64: 8, 24, 128>}, {transform_indices = @transform_2, window_bounds = array<i64: 1, 1>}]} {
    %c0 = arith.constant 0 : index
    %c0_0 = arith.constant 0 : index
    %c0_1 = arith.constant 0 : index
    %0 = vector.load %arg1[%c0, %c0_0, %c0_1] : memref<8x24x128xf32, #tpu.memory_space<vmem>>, vector<8x24x128xf32>
    %c0_2 = arith.constant 0 : index
    %c0_3 = arith.constant 0 : index
    %c0_4 = arith.constant 0 : index
    %1 = vector.load %arg2[%c0_2, %c0_3, %c0_4] : memref<8x24x128xf32, #tpu.memory_space<vmem>>, vector<8x24x128xf32>
    %2 = vector.extract_strided_slice %0 {offsets = [0, 1, 1], sizes = [8, 23, 127], strides = [1, 1, 1]} : vector<8x24x128xf32> to vector<8x23x127xf32>
    %3 = vector.extract_strided_slice %0 {offsets = [0, 1, 0], sizes = [8, 23, 127], strides = [1, 1, 1]} : vector<8x24x128xf32> to vector<8x23x127xf32>
    %4 = arith.subf %2, %3 : vector<8x23x127xf32>
    %5 = math.absf %4 : vector<8x23x127xf32>
    %6 = vector.extract_strided_slice %0 {offsets = [0, 1, 1], sizes = [8, 23, 127], strides = [1, 1, 1]} : vector<8x24x128xf32> to vector<8x23x127xf32>
    %7 = vector.extract_strided_slice %0 {offsets = [0, 0, 1], sizes = [8, 23, 127], strides = [1, 1, 1]} : vector<8x24x128xf32> to vector<8x23x127xf32>
    %8 = arith.subf %6, %7 : vector<8x23x127xf32>
    %9 = math.absf %8 : vector<8x23x127xf32>
    %10 = vector.extract_strided_slice %1 {offsets = [0, 1, 1], sizes = [8, 23, 127], strides = [1, 1, 1]} : vector<8x24x128xf32> to vector<8x23x127xf32>
    %11 = vector.extract_strided_slice %1 {offsets = [0, 1, 0], sizes = [8, 23, 127], strides = [1, 1, 1]} : vector<8x24x128xf32> to vector<8x23x127xf32>
    %12 = arith.subf %10, %11 : vector<8x23x127xf32>
    %13 = math.absf %12 : vector<8x23x127xf32>
    %14 = vector.extract_strided_slice %1 {offsets = [0, 1, 1], sizes = [8, 23, 127], strides = [1, 1, 1]} : vector<8x24x128xf32> to vector<8x23x127xf32>
    %15 = vector.extract_strided_slice %1 {offsets = [0, 0, 1], sizes = [8, 23, 127], strides = [1, 1, 1]} : vector<8x24x128xf32> to vector<8x23x127xf32>
    %16 = arith.subf %14, %15 : vector<8x23x127xf32>
    %17 = math.absf %16 : vector<8x23x127xf32>
    %18 = vector.extract_strided_slice %13 {offsets = [0, 0, 0], sizes = [8, 23, 125], strides = [1, 1, 1]} : vector<8x23x127xf32> to vector<8x23x125xf32>
    %19 = vector.extract_strided_slice %13 {offsets = [0, 0, 1], sizes = [8, 23, 125], strides = [1, 1, 1]} : vector<8x23x127xf32> to vector<8x23x125xf32>
    %20 = arith.addf %18, %19 : vector<8x23x125xf32>
    %21 = vector.extract_strided_slice %13 {offsets = [0, 0, 2], sizes = [8, 23, 125], strides = [1, 1, 1]} : vector<8x23x127xf32> to vector<8x23x125xf32>
    %22 = arith.addf %20, %21 : vector<8x23x125xf32>
    %23 = vector.extract_strided_slice %22 {offsets = [0, 0, 0], sizes = [8, 21, 125], strides = [1, 1, 1]} : vector<8x23x125xf32> to vector<8x21x125xf32>
    %24 = vector.extract_strided_slice %22 {offsets = [0, 1, 0], sizes = [8, 21, 125], strides = [1, 1, 1]} : vector<8x23x125xf32> to vector<8x21x125xf32>
    %25 = arith.addf %23, %24 : vector<8x21x125xf32>
    %26 = vector.extract_strided_slice %22 {offsets = [0, 2, 0], sizes = [8, 21, 125], strides = [1, 1, 1]} : vector<8x23x125xf32> to vector<8x21x125xf32>
    %27 = arith.addf %25, %26 : vector<8x21x125xf32>
    %28 = vector.extract_strided_slice %17 {offsets = [0, 0, 0], sizes = [8, 23, 125], strides = [1, 1, 1]} : vector<8x23x127xf32> to vector<8x23x125xf32>
    %29 = vector.extract_strided_slice %17 {offsets = [0, 0, 1], sizes = [8, 23, 125], strides = [1, 1, 1]} : vector<8x23x127xf32> to vector<8x23x125xf32>
    %30 = arith.addf %28, %29 : vector<8x23x125xf32>
    %31 = vector.extract_strided_slice %17 {offsets = [0, 0, 2], sizes = [8, 23, 125], strides = [1, 1, 1]} : vector<8x23x127xf32> to vector<8x23x125xf32>
    %32 = arith.addf %30, %31 : vector<8x23x125xf32>
    %33 = vector.extract_strided_slice %32 {offsets = [0, 0, 0], sizes = [8, 21, 125], strides = [1, 1, 1]} : vector<8x23x125xf32> to vector<8x21x125xf32>
    %34 = vector.extract_strided_slice %32 {offsets = [0, 1, 0], sizes = [8, 21, 125], strides = [1, 1, 1]} : vector<8x23x125xf32> to vector<8x21x125xf32>
    %35 = arith.addf %33, %34 : vector<8x21x125xf32>
    %36 = vector.extract_strided_slice %32 {offsets = [0, 2, 0], sizes = [8, 21, 125], strides = [1, 1, 1]} : vector<8x23x125xf32> to vector<8x21x125xf32>
    %37 = arith.addf %35, %36 : vector<8x21x125xf32>
    %38 = vector.extract_strided_slice %5 {offsets = [0, 1, 1], sizes = [8, 21, 125], strides = [1, 1, 1]} : vector<8x23x127xf32> to vector<8x21x125xf32>
    %cst = arith.constant -1.11111116 : f32
    %39 = vector.broadcast %cst : f32 to vector<8x21x125xf32>
    %40 = arith.mulf %39, %27 : vector<8x21x125xf32>
    %41 = math.exp %40 : vector<8x21x125xf32>
    %42 = arith.mulf %38, %41 : vector<8x21x125xf32>
    %43 = vector.extract_strided_slice %9 {offsets = [0, 1, 1], sizes = [8, 21, 125], strides = [1, 1, 1]} : vector<8x23x127xf32> to vector<8x21x125xf32>
    %cst_5 = arith.constant -1.11111116 : f32
    %44 = vector.broadcast %cst_5 : f32 to vector<8x21x125xf32>
    %45 = arith.mulf %44, %37 : vector<8x21x125xf32>
    %46 = math.exp %45 : vector<8x21x125xf32>
    %47 = arith.mulf %43, %46 : vector<8x21x125xf32>
    %48 = arith.addf %42, %47 : vector<8x21x125xf32>
    %49 = vector.shape_cast %48 : vector<8x21x125xf32> to vector<1x8x21x125xf32>
    %cst_6 = arith.constant dense<0.000000e+00> : vector<1xf32>
    %50 = vector.multi_reduction <add>, %49, %cst_6 [1, 2, 3] : vector<1x8x21x125xf32> to vector<1xf32>
    %51 = vector.shape_cast %50 : vector<1xf32> to vector<1x1x1x1xf32>
    %52 = vector.extract %51[0, 0, 0, 0] : f32 from vector<1x1x1x1xf32>
    %c0_7 = arith.constant 0 : index
    %c0_8 = arith.constant 0 : index
    %53 = memref.load %arg3[%c0_7, %c0_8] : memref<1x1xf32, #tpu.memory_space<smem>>
    memref.store %52, %arg3[%c0_7, %c0_8] : memref<1x1xf32, #tpu.memory_space<smem>>
    return
  }
  func.func @transform_0(%arg0: i32) -> (i32, i32, i32) {
    %c0_i32 = arith.constant 0 : i32
    %c0_i32_0 = arith.constant 0 : i32
    %c0_i32_1 = arith.constant 0 : i32
    return %arg0, %c0_i32, %c0_i32_0 : i32, i32, i32
  }
  func.func @transform_1(%arg0: i32) -> (i32, i32, i32) {
    %c0_i32 = arith.constant 0 : i32
    %c0_i32_0 = arith.constant 0 : i32
    %c0_i32_1 = arith.constant 0 : i32
    return %arg0, %c0_i32, %c0_i32_0 : i32, i32, i32
  }
  func.func @transform_2(%arg0: i32) -> (i32, i32) {
    %c0_i32 = arith.constant 0 : i32
    %c0_i32_0 = arith.constant 0 : i32
    return %arg0, %c0_i32 : i32, i32
  }
}

</mosaic_0001>

<bundles_post_ra>
// kernel: smooth_loss_pallas.1
= control target key start
LH: loop header
LB: loop body
LE: loop exit
PB: predicated region body
PF: predicated region fallthrough
CT: control target
= control target key end

     0   :  { %s2230_s13 = smov 1   ;;  %s3759_s0 = inlined_call_operand.vmem [shape: f32[8,24,128], index: 0, kind: input, shape index: {}]   ;;  %s3760_s1 = inlined_call_operand.vmem [shape: f32[8,24,128], index: 1, kind: input, shape index: {}]   ;;  %s3761_s2 = inlined_call_operand.hbm [shape: f32[1,1], index: 2, kind: output, shape index: {}]  }
   0x1   :  { %v2252_v0 = vld [vmem:[%s3760_s1] sm:$0xff]  ;;  %v2257_v1 = vld [vmem:[%s3760_s1 + $0x10] sm:$0xff]  ;;  %v2266_v2 = vld [vmem:[%s3760_s1 + $0x8] sm:$0xff] }
   0x2   :  { %341 = vrot.lane.b32.xlu0 %v2252_v0, %s2230_s13  ;;  %345 = vrot.lane.b32.xlu1 %v2257_v1, %s2230_s13  ;;  %v2271_v3 = vld [vmem:[%s3760_s1 + $0x18] sm:$0xff]  ;;  %v2280_v4 = vld [vmem:[%s3760_s1 + $0x20] sm:$0xff] }
   0x3   :  { %v2285_v5 = vld [vmem:[%s3760_s1 + $0x28] sm:$0xff]  ;;  %v2294_v6 = vld [vmem:[%s3760_s1 + $0x38] sm:$0xff]  ;;  %v2299_v7 = vld [vmem:[%s3760_s1 + $0x30] sm:$0xff] }
   0x6   :  { %343 = vrot.lane.b32.xlu0 %v2266_v2, %s2230_s13  ;;  %347 = vrot.lane.b32.xlu1 %v2271_v3, %s2230_s13 }
   0xa   :  { %349 = vrot.lane.b32.xlu0 %v2280_v4, %s2230_s13  ;;  %351 = vrot.lane.b32.xlu1 %v2285_v5, %s2230_s13 }
   0xb   :  { %7 = vsyncpa [#allocation3], 0  ;;  %v2308_v8 = vld [vmem:[%s3760_s1 + $0x40] sm:$0xff]  ;;  %v2313_v9 = vld [vmem:[%s3760_s1 + $0x48] sm:$0xff]  ;;  %v462_v24 = vrot.slane %v2266_v2, 7  ;;  %v461_v25 = vrot.slane %v2252_v0, 7 }
   0xc   :  { %v2322_v10 = vld [vmem:[%s3760_s1 + $0x50] sm:$0xff]  ;;  %v2327_v11 = vld [vmem:[%s3760_s1 + $0x58] sm:$0xff]  ;;  %v2336_v12 = vld [vmem:[%s3760_s1 + $0x68] sm:$0xff]  ;;  %vm204_vm0 = vcmask 1040384   ;;  %v464_v26 = vrot.slane %v2257_v1, 7  ;;  %v467_v35 = vrot.slane %v2280_v4, 7 }
   0xd   :  { %v2341_v13 = vld [vmem:[%s3760_s1 + $0x60] sm:$0xff]  ;;  %v2350_v14 = vld [vmem:[%s3760_s1 + $0x78] sm:$0xff]  ;;  %v2355_v15 = vld [vmem:[%s3760_s1 + $0x70] sm:$0xff]  ;;  %v463_v29 = vsel %vm204_vm0, %v461_v25, %v462_v24  ;;  %v525_v30 = vsub.f32 %v2252_v0, %v461_v25  ;;  %v466_v36 = vrot.slane %v2271_v3, 7  ;;  %s2231_s10 = smov 127   ;;  %v472_v43 = vrot.slane %v2294_v6, 7 }
   0xe   :  { %355 = vrot.lane.b32.xlu1 %v2294_v6, %s2230_s13  ;;  %353 = vrot.lane.b32.xlu0 %v2299_v7, %s2230_s13  ;;  %v2364_v16 = vld [vmem:[%s3760_s1 + $0x88] sm:$0xff]  ;;  %v2369_v17 = vld [vmem:[%s3760_s1 + $0x80] sm:$0xff]  ;;  %v526_v31 = vsub.f32 %v2266_v2, %v463_v29  ;;  %v465_v33 = vsel %vm204_vm0, %v462_v24, %v464_v26  ;;  %v471_v44 = vrot.slane %v2299_v7, 7  ;;  %s2232_s11 = smov 126   ;;  %v469_v46 = vrot.slane %v2285_v5, 7  ;;  %s2218_s23 = scalar_lea.hbm %s3761_s2, 16 }
   0xf   :  { %v2378_v18 = vld [vmem:[%s3760_s1 + $0x98] sm:$0xff]  ;;  %v2383_v19 = vld [vmem:[%s3760_s1 + $0x90] sm:$0xff]  ;;  %v2392_v20 = vld [vmem:[%s3760_s1 + $0xa8] sm:$0xff]  ;;  %v2441_v37 = vand.u32 2147483647, %v525_v30  ;;  %v527_v38 = vsub.f32 %v2257_v1, %v465_v33  ;;  %v468_v40 = vsel %vm204_vm0, %v466_v36, %v467_v35  ;;  %v528_v48 = vsub.f32 %v2271_v3, %v466_v36  ;;  %p2219_p0 = scmp.ne.s32.totalorder %s3761_s2, %s2218_s23  ;;  %p2222_p1 = scmp.lt.u32.totalorder %s2218_s23, %s3761_s2 }
  0x10   :  { %v2397_v21 = vld [vmem:[%s3760_s1 + $0xa0] sm:$0xff]  ;;  %v2406_v22 = vld [vmem:[%s3760_s1 + $0xb8] sm:$0xff]  ;;  %v2411_v23 = vld [vmem:[%s3760_s1 + $0xb0] sm:$0xff]  ;;  %v2445_v39 = vand.u32 2147483647, %v526_v31  ;;  %v529_v42 = vsub.f32 %v2280_v4, %v468_v40  ;;  %v473_v47 = vsel %vm204_vm0, %v471_v44, %v472_v43  ;;  %v470_v50 = vsel %vm204_vm0, %v467_v35, %v469_v46 }
  0x11   :  { %v13_v27 = vld [vmem:[%s3759_s0 + $0x8] sm:$0xff]  ;;  %v12_v28 = vld [vmem:[%s3759_s0] sm:$0xff]  ;;  %v15_v32 = vld [vmem:[%s3759_s0 + $0x18] sm:$0xff]  ;;  %v2450_v41 = vand.u32 2147483647, %v527_v38  ;;  %v532_v49 = vsub.f32 %v2294_v6, %v473_v47  ;;  %v530_v52 = vsub.f32 %v2285_v5, %v470_v50  ;;  %v474_v55 = vrot.slane %v2308_v8, 7  ;;  %p2224_p2 = pnand %p2222_p1, %p2219_p0 }
  0x12   :  { %357 = vrot.lane.b32.xlu0 %v2308_v8, %s2230_s13  ;;  %359 = vrot.lane.b32.xlu1 %v2313_v9, %s2230_s13  ;;  %v14_v34 = vld [vmem:[%s3759_s0 + $0x10] sm:$0xff]  ;;  %v2461_v45 = vand.u32 2147483647, %v529_v42  ;;  %v2474_v51 = vand.u32 2147483647, %v528_v48  ;;  %v531_v56 = vsub.f32 %v2299_v7, %v471_v44  ;;  %v476_v48 = vrot.slane %v2313_v9, 7 }
  0x13   :  { %v2479_v53 = vand.u32 2147483647, %v532_v49  ;;  %v2483_v54 = vand.u32 2147483647, %v530_v52  ;;  %v475_v57 = vsel %vm204_vm0, %v472_v43, %v474_v55  ;;  %v477_v49 = vrot.slane %v2322_v10, 7 }
  0x14   :  { %v2496_v58 = vand.u32 2147483647, %v531_v56  ;;  %v533_v59 = vsub.f32 %v2308_v8, %v475_v57  ;;  %v479_v50 = vrot.slane %v2327_v11, 7  ;;  %v534_v57 = vsub.f32 %v2313_v9, %v476_v48 }
  0x15   :  { %vm813_vm1 = vcmask 1046528   ;;  %vm902_vm2 = vcmask 1045504   ;;  %vm2031_vm3 = vcmask 1022976   ;;  %vm2035_vm4 = vcmask 1019904  }
  0x16   :  { %361 = vrot.lane.b32.xlu0 %v2322_v10, %s2230_s13  ;;  %363 = vrot.lane.b32.xlu1 %v2327_v11, %s2230_s13  ;;  %v2501_v60 = vand.u32 2147483647, %v533_v59  ;;  %v480_v59 = vsel %vm204_vm0, %v477_v49, %v479_v50 }
  0x1a   :  { %367 = vrot.lane.b32.xlu1 %v2336_v12, %s2230_s13  ;;  %365 = vrot.lane.b32.xlu0 %v2341_v13, %s2230_s13 }
  0x1e   :  { %371 = vrot.lane.b32.xlu1 %v2350_v14, %s2230_s13  ;;  %369 = vrot.lane.b32.xlu0 %v2355_v15, %s2230_s13 }
  0x22   :  { %375 = vrot.lane.b32.xlu1 %v2364_v16, %s2230_s13  ;;  %373 = vrot.lane.b32.xlu0 %v2369_v17, %s2230_s13 }
  0x26   :  { %379 = vrot.lane.b32.xlu1 %v2378_v18, %s2230_s13  ;;  %377 = vrot.lane.b32.xlu0 %v2383_v19, %s2230_s13 }
  0x2a   :  { %383 = vrot.lane.b32.xlu1 %v2392_v20, %s2230_s13  ;;  %381 = vrot.lane.b32.xlu0 %v2397_v21, %s2230_s13 }
  0x2e   :  { %387 = vrot.lane.b32.xlu1 %v2406_v22, %s2230_s13  ;;  %385 = vrot.lane.b32.xlu0 %v2411_v23, %s2230_s13 }
  0x32   :  { %86 = vrot.lane.b32.xlu1 %v13_v27, %s2230_s13  ;;  %84 = vrot.lane.b32.xlu0 %v12_v28, %s2230_s13 }
  0x36   :  { %90 = vrot.lane.b32.xlu1 %v15_v32, %s2230_s13  ;;  %88 = vrot.lane.b32.xlu0 %v14_v34, %s2230_s13 }
  0x3a   :  { %1015 = vrot.lane.b32.xlu1 %v2441_v37, %s2231_s10  ;;  %1017 = vrot.lane.b32.xlu0 %v2445_v39, %s2231_s10 }
  0x3e   :  { %1019 = vrot.lane.b32.xlu1 %v2450_v41, %s2231_s10  ;;  %1113 = vrot.lane.b32.xlu0 %v2445_v39, %s2232_s11 }
  0x42   :  { %1111 = vrot.lane.b32.xlu1 %v2441_v37, %s2232_s11  ;;  %1023 = vrot.lane.b32.xlu0 %v2461_v45, %s2231_s10 }
  0x46   :  { %1115 = vrot.lane.b32.xlu1 %v2450_v41, %s2232_s11  ;;  %1119 = vrot.lane.b32.xlu0 %v2461_v45, %s2232_s11 }
  0x4a   :  { %1021 = vrot.lane.b32.xlu1 %v2474_v51, %s2231_s10  ;;  %1029 = vrot.lane.b32.xlu0 %v2479_v53, %s2231_s10 }
  0x4e   :  { %1025 = vrot.lane.b32.xlu1 %v2483_v54, %s2231_s10 }
  0x52   :  { %1117 = vrot.lane.b32.xlu1 %v2474_v51, %s2232_s11 }
  0x56   :  { %1121 = vrot.lane.b32.xlu1 %v2483_v54, %s2232_s11 }
  0x5a   :  { %1027 = vrot.lane.b32.xlu1 %v2496_v58, %s2231_s10 }
  0x5e   :  { %1031 = vrot.lane.b32.xlu1 %v2501_v60, %s2231_s10 }
  0x62   :  { %1123 = vrot.lane.b32.xlu1 %v2496_v58, %s2232_s11 }
  0x74   :  { %v342_v61 = vpop.permute.xlu0 %341  ;;  %v346_v62 = vpop.permute.xlu1 %345 }
  0x75   :  { %v413_v63 = vsub.f32 %v2252_v0, %v342_v61  ;;  %v415_v24 = vsub.f32 %v2257_v1, %v346_v62 }
  0x77   :  { %v2509_v25 = vand.u32 2147483647, %v413_v63  ;;  %v2511_v28 = vand.u32 2147483647, %v415_v24  ;;  %v536_v63 = vsub.f32 %v2327_v11, %v480_v59 }
  0x78   :  { %v344_v26 = vpop.permute.xlu0 %343  ;;  %v348_v27 = vpop.permute.xlu1 %347 }
  0x79   :  { %v414_v29 = vsub.f32 %v2266_v2, %v344_v26  ;;  %597 = vrot.lane.b32.xlu0 %v2509_v25, %s2231_s10  ;;  %v416_v33 = vsub.f32 %v2271_v3, %v348_v27  ;;  %v2591_v26 = vand.u32 2147483647, %v536_v63 }
  0x7b   :  { %v2516_v30 = vand.u32 2147483647, %v414_v29  ;;  %v2530_v36 = vand.u32 2147483647, %v416_v33 }
  0x7c   :  { %v350_v31 = vpop.permute.xlu0 %349  ;;  %v352_v32 = vpop.permute.xlu1 %351 }
  0x7d   :  { %599 = vrot.lane.b32.xlu1 %v2516_v30, %s2231_s10  ;;  %601 = vrot.lane.b32.xlu0 %v2511_v28, %s2231_s10  ;;  %v417_v0 = vsub.f32 %v2280_v4, %v350_v31  ;;  %v418_v38 = vsub.f32 %v2285_v5, %v352_v32 }
  0x7f   :  { %v2524_v34 = vand.u32 2147483647, %v417_v0  ;;  %v2538_v42 = vand.u32 2147483647, %v418_v38 }
  0x80   :  { %v356_v1 = vpop.permute.xlu1 %355  ;;  %v354_v2 = vpop.permute.xlu0 %353 }
  0x81   :  { %695 = vrot.lane.b32.xlu1 %v2516_v30, %s2232_s11  ;;  %693 = vrot.lane.b32.xlu0 %v2509_v25, %s2232_s11  ;;  %v420_v3 = vsub.f32 %v2294_v6, %v356_v1  ;;  %v419_v46 = vsub.f32 %v2299_v7, %v354_v2 }
  0x83   :  { %v2540_v43 = vand.u32 2147483647, %v420_v3  ;;  %v2563_v55 = vand.u32 2147483647, %v419_v46  ;;  %v484_v3 = vrot.slane %v2355_v15, 7 }
  0x84   :  { %v360_v35 = vpop.permute.xlu1 %359  ;;  %v358_v4 = vpop.permute.xlu0 %357 }
  0x85   :  { %605 = vrot.lane.b32.xlu1 %v2524_v34, %s2231_s10  ;;  %697 = vrot.lane.b32.xlu0 %v2511_v28, %s2232_s11  ;;  %v421_v7 = vsub.f32 %v2308_v8, %v358_v4  ;;  %v2582_v8 = vand.u32 2147483647, %v534_v57  ;;  %v422_v32 = vsub.f32 %v2313_v9, %v360_v35  ;;  %v481_v9 = vrot.slane %v2341_v13, 7 }
  0x86   :  { %v482_v35 = vrot.slane %v2336_v12, 7  ;;  %v478_v4 = vsel %vm204_vm0, %v476_v48, %v477_v49 }
  0x87   :  { %v2576_v62 = vand.u32 2147483647, %v421_v7  ;;  %v2608_v33 = vand.u32 2147483647, %v422_v32 }
  0x88   :  { %v364_v40 = vpop.permute.xlu1 %363  ;;  %v362_v6 = vpop.permute.xlu0 %361  ;;  %v485_v50 = vsel %vm204_vm0, %v482_v35, %v484_v3 }
  0x89   :  { %701 = vrot.lane.b32.xlu1 %v2524_v34, %s2232_s11  ;;  %603 = vrot.lane.b32.xlu0 %v2530_v36, %s2231_s10  ;;  %v423_v47 = vsub.f32 %v2322_v10, %v362_v6  ;;  %v424_v2 = vsub.f32 %v2327_v11, %v364_v40  ;;  %v537_v40 = vsub.f32 %v2341_v13, %v481_v9 }
  0x8a   :  { %v539_v7 = vsub.f32 %v2355_v15, %v485_v50  ;;  %v483_v50 = vsel %vm204_vm0, %v481_v9, %v482_v35 }
  0x8b   :  { %v2566_v56 = vand.u32 2147483647, %v423_v47  ;;  %v2620_v46 = vand.u32 2147483647, %v424_v2  ;;  %v2637_v48 = vand.u32 2147483647, %v537_v40 }
  0x8c   :  { %v368_v5 = vpop.permute.xlu1 %367  ;;  %v366_v27 = vpop.permute.xlu0 %365  ;;  %v489_v40 = vrot.slane %v2364_v16, 7 }
  0x8d   :  { %611 = vrot.lane.b32.xlu1 %v2540_v43, %s2231_s10  ;;  %607 = vrot.lane.b32.xlu0 %v2538_v42, %s2231_s10  ;;  %v426_v38 = vsub.f32 %v2336_v12, %v368_v5  ;;  %v535_v5 = vsub.f32 %v2322_v10, %v478_v4  ;;  %3781 = vst [vmem:[#allocation8_spill] sm:$0xff] %v2637_v48  ;;  %v2650_v10 = vand.u32 2147483647, %v539_v7  ;;  %v486_v4 = vrot.slane %v2350_v14, 7 }
  0x8f   :  { %v2622_v11 = vand.u32 2147483647, %v426_v38  ;;  %v2639_v49 = vand.u32 2147483647, %v535_v5  ;;  %3783 = vst [vmem:[#allocation10_spill] sm:$0xff] %v2650_v10  ;;  %v425_v38 = vsub.f32 %v2341_v13, %v366_v27  ;;  %v487_v5 = vrot.slane %v2369_v17, 7 }
  0x90   :  { %v2550_v44 = vpop.permute.xlu1 %371  ;;  %v370_v0 = vpop.permute.xlu0 %369 }
  0x91   :  { %707 = vrot.lane.b32.xlu1 %v2540_v43, %s2232_s11  ;;  %699 = vrot.lane.b32.xlu0 %v2530_v36, %s2232_s11  ;;  %3780 = vst [vmem:[#allocation7_spill] sm:$0xff] %v2622_v11  ;;  %3782 = vst [vmem:[#allocation9_spill] sm:$0xff] %v2639_v49  ;;  %v2677_v7 = vand.u32 2147483647, %v425_v38  ;;  %v427_v13 = vsub.f32 %v2355_v15, %v370_v0  ;;  %v490_v9 = vsel %vm204_vm0, %v487_v5, %v489_v40 }
  0x93   :  { %3784 = vst [vmem:[#allocation11_spill] sm:$0xff] %v2677_v7  ;;  %v2692_v35 = vand.u32 2147483647, %v427_v13 }
  0x94   :  { %v2561_v52 = vpop.permute.xlu1 %375  ;;  %v374_v6 = vpop.permute.xlu0 %373 }
  0x95   :  { %1127 = vrot.lane.b32.xlu1 %v2501_v60, %s2232_s11  ;;  %703 = vrot.lane.b32.xlu0 %v2538_v42, %s2232_s11  ;;  %v429_v27 = vsub.f32 %v2369_v17, %v374_v6  ;;  %3786 = vst [vmem:[#allocation13_spill] sm:$0xff] %v2692_v35 }
  0x97   :  { %v2694_v15 = vand.u32 2147483647, %v429_v27  ;;  %v428_v27 = vsub.f32 %v2350_v14, %v2550_v44 }
  0x98   :  { %v2574_v61 = vpop.permute.xlu1 %379  ;;  %v2642_v57 = vpop.permute.xlu0 %377 }
  0x99   :  { %617 = vrot.lane.b32.xlu1 %v2566_v56, %s2231_s10  ;;  %609 = vrot.lane.b32.xlu0 %v2563_v55, %s2231_s10  ;;  %3787 = vst [vmem:[#allocation14_spill] sm:$0xff] %v2694_v15  ;;  %v432_v44 = vsub.f32 %v2378_v18, %v2574_v61 }
  0x9b   :  { %v2760_v61 = vand.u32 2147483647, %v432_v44 }
  0x9c   :  { %v2585_v24 = vpop.permute.xlu1 %383  ;;  %v2652_v63 = vpop.permute.xlu0 %381 }
  0x9d   :  { %1033 = vrot.lane.b32.xlu1 %v2582_v8, %s2231_s10  ;;  %613 = vrot.lane.b32.xlu0 %v2576_v62, %s2231_s10  ;;  %3794 = vst [vmem:[#allocation20_spill] sm:$0xff] %v2760_v61 }
  0xa0   :  { %v2593_v29 = vpop.permute.xlu1 %387  ;;  %v2664_v2 = vpop.permute.xlu0 %385 }
  0xa1   :  { %1037 = vrot.lane.b32.xlu1 %v2591_v26, %s2231_s10  ;;  %705 = vrot.lane.b32.xlu0 %v2563_v55, %s2232_s11 }
  0xa4   :  { %v2599_v31 = vpop.permute.xlu1 %86 }
  0xa5   :  { %3778 = vst [vmem:[#allocation5_spill] sm:$0xff] %v2599_v31  ;;  %713 = vrot.lane.b32.xlu1 %v2566_v56, %s2232_s11  ;;  %709 = vrot.lane.b32.xlu0 %v2576_v62, %s2232_s11  ;;  %v540_v31 = vsub.f32 %v2350_v14, %v486_v4  ;;  %v430_v14 = vsub.f32 %v2364_v16, %v2561_v52 }
  0xa7   :  { %v2700_v0 = vand.u32 2147483647, %v540_v31  ;;  %v2758_v52 = vand.u32 2147483647, %v430_v14 }
  0xa8   :  { %v2606_v1 = vpop.permute.xlu1 %90 }
  0xa9   :  { %3779 = vst [vmem:[#allocation6_spill] sm:$0xff] %v2606_v1  ;;  %1129 = vrot.lane.b32.xlu1 %v2582_v8, %s2232_s11  ;;  %1125 = vrot.lane.b32.xlu0 %v2479_v53, %s2232_s11  ;;  %v2681_v1 = vpop.permute.xlu0 %84  ;;  %3788 = vst [vmem:[#allocation15_spill] sm:$0xff] %v2700_v0 }
  0xaa   :  { %3785 = vst [vmem:[#allocation12_spill] sm:$0xff] %v2681_v1  ;;  %v494_v1 = vrot.slane %v2397_v21, 7 }
  0xac   :  { %v2630_v47 = vpop.permute.xlu1 %1015 }
  0xad   :  { %1133 = vrot.lane.b32.xlu1 %v2591_v26, %s2232_s11  ;;  %615 = vrot.lane.b32.xlu0 %v2608_v33, %s2231_s10  ;;  %v2704_v38 = vpop.permute.xlu0 %88 }
  0xae   :  { %3790 = vst [vmem:[#allocation17_spill] sm:$0xff] %v2704_v38  ;;  %v3771_v38 = vrot.slane %v2378_v18, 7 }
  0xb0   :  { %v2644_v59 = vpop.permute.xlu1 %1019 }
  0xb1   :  { %623 = vrot.lane.b32.xlu1 %v2622_v11, %s2231_s10  ;;  %619 = vrot.lane.b32.xlu0 %v2620_v46, %s2231_s10  ;;  %v1018_v13 = vpop.permute.xlu0 %1017 }
  0xb4   :  { %v2658_v32 = vpop.permute.xlu1 %1111 }
  0xb5   :  { %1039 = vrot.lane.b32.xlu1 %v2637_v48, %s2231_s10  ;;  %1035 = vrot.lane.b32.xlu0 %v2639_v49, %s2231_s10 }
  0xb8   :  { %v2667_v3 = vpop.permute.xlu1 %1115 }
  0xb9   :  { %1043 = vrot.lane.b32.xlu1 %v2650_v10, %s2231_s10  ;;  %711 = vrot.lane.b32.xlu0 %v2608_v33, %s2232_s11 }
  0xbd   :  { %719 = vrot.lane.b32.xlu1 %v2622_v11, %s2232_s11  ;;  %715 = vrot.lane.b32.xlu0 %v2620_v46, %s2232_s11  ;;  %v2689_v11 = vpop.permute.xlu1 %1021 }
  0xc1   :  { %1135 = vrot.lane.b32.xlu1 %v2637_v48, %s2232_s11  ;;  %1131 = vrot.lane.b32.xlu0 %v2639_v49, %s2232_s11  ;;  %v538_v48 = vsub.f32 %v2336_v12, %v483_v50  ;;  %v542_v12 = vsub.f32 %v2364_v16, %v490_v9  ;;  %v2707_v50 = vpop.permute.xlu1 %1025  ;;  %v495_v16 = vsel %vm204_vm0, %v3771_v38, %v494_v1 }
  0xc3   :  { %v2702_v6 = vand.u32 2147483647, %v538_v48  ;;  %v2713_v40 = vand.u32 2147483647, %v542_v12  ;;  %v1114_v48 = vpop.permute.xlu0 %1113 }
  0xc5   :  { %1139 = vrot.lane.b32.xlu1 %v2650_v10, %s2232_s11  ;;  %621 = vrot.lane.b32.xlu0 %v2677_v7, %s2231_s10  ;;  %3789 = vst [vmem:[#allocation16_spill] sm:$0xff] %v2702_v6  ;;  %3791 = vst [vmem:[#allocation18_spill] sm:$0xff] %v2713_v40  ;;  %v2719_v31 = vpop.permute.xlu1 %1117  ;;  %v545_v10 = vsub.f32 %v2397_v21, %v495_v16 }
  0xc7   :  { %v2743_v12 = vpop.permute.xlu0 %1023 }
  0xc9   :  { %629 = vrot.lane.b32.xlu1 %v2694_v15, %s2231_s10  ;;  %625 = vrot.lane.b32.xlu0 %v2692_v35, %s2231_s10  ;;  %v2727_v9 = vpop.permute.xlu1 %1121 }
  0xcd   :  { %1045 = vrot.lane.b32.xlu1 %v2700_v0, %s2231_s10  ;;  %1041 = vrot.lane.b32.xlu0 %v2702_v6, %s2231_s10 }
  0xd1   :  { %1049 = vrot.lane.b32.xlu1 %v2713_v40, %s2231_s10  ;;  %717 = vrot.lane.b32.xlu0 %v2677_v7, %s2232_s11  ;;  %v2768_v7 = vpop.permute.xlu0 %1119 }
  0xd5   :  { %725 = vrot.lane.b32.xlu1 %v2694_v15, %s2232_s11  ;;  %721 = vrot.lane.b32.xlu0 %v2692_v35, %s2232_s11  ;;  %v488_v15 = vsel %vm204_vm0, %v486_v4, %v487_v5  ;;  %v2737_v35 = vand.u32 2147483647, %v428_v27  ;;  %v2752_v4 = vpop.permute.xlu1 %1027  ;;  %v1088_v27 = vadd.f32 %v1018_v13, %v2445_v39 }
  0xd6   :  { %v541_v5 = vsub.f32 %v2369_v17, %v488_v15  ;;  %v2790_v15 = vand.u32 2147483647, %v545_v10 }
  0xd7   :  { %3792 = vst [vmem:[#allocation19_spill] sm:$0xff] %v2737_v35  ;;  %v1184_v39 = vadd.f32 %v1114_v48, %v1088_v27 }
  0xd8   :  { %v2776_v1 = vand.u32 2147483647, %v541_v5 }
  0xd9   :  { %1141 = vrot.lane.b32.xlu1 %v2700_v0, %s2232_s11  ;;  %1137 = vrot.lane.b32.xlu0 %v2702_v6, %s2232_s11  ;;  %v3793_v0 = vrot.slane %v2383_v19, 7  ;;  %v1232_v13 = vrot.slane %v1184_v39, 1  ;;  %v1320_v14 = vrot.slane %v1184_v39, 2 }
  0xdb   :  { %v543_v6 = vsub.f32 %v2383_v19, %v3793_v0  ;;  %v1087_v0 = vadd.f32 %v2630_v47, %v2441_v37  ;;  %v2779_v47 = vpop.permute.xlu1 %1031 }
  0xdd   :  { %1145 = vrot.lane.b32.xlu1 %v2713_v40, %s2232_s11  ;;  %627 = vrot.lane.b32.xlu0 %v2737_v35, %s2231_s10  ;;  %v1089_v40 = vadd.f32 %v2644_v59, %v2450_v41  ;;  %v2774_v17 = vand.u32 2147483647, %v543_v6  ;;  %v1183_v37 = vadd.f32 %v2658_v32, %v1087_v0  ;;  %v2788_v59 = vpop.permute.xlu0 %1029  ;;  %v431_v0 = vsub.f32 %v2383_v19, %v2642_v57 }
  0xde   :  { %v435_v57 = vsub.f32 %v2411_v23, %v2664_v2  ;;  %v1090_v2 = vadd.f32 %v2689_v11, %v2474_v51  ;;  %v3798_v51 = vrot.slane %v2411_v23, 7 }
  0xdf   :  { %v2782_v41 = vadd.f32 %v2667_v3, %v1089_v40  ;;  %v1231_v6 = vrot.slane %v1183_v37, 1  ;;  %v2797_v3 = vpop.permute.xlu1 %1123  ;;  %v1319_v40 = vrot.slane %v1183_v37, 2 }
  0xe1   :  { %635 = vrot.lane.b32.xlu1 %v2760_v61, %s2231_s10  ;;  %631 = vrot.lane.b32.xlu0 %v2758_v52, %s2231_s10  ;;  %v3774_v32 = vrot.slane %v2782_v41, 1  ;;  %v1233_v48 = vsel %vm813_vm1, %v1231_v6, %v1232_v13  ;;  %v1321_v6 = vsel %vm902_vm2, %v1319_v40, %v1320_v14  ;;  %v3795_v49 = vrot.slane %v2782_v41, 2 }
  0xe2   :  { %v1295_v16 = vadd.f32 %v1233_v48, %v1183_v37  ;;  %v433_v37 = vsub.f32 %v2397_v21, %v2652_v63  ;;  %v3796_v48 = vrot.slane %v2378_v18, 7  ;;  %v2832_v63 = vand.u32 2147483647, %v431_v0 }
  0xe3   :  { %v1235_v5 = vsel %vm813_vm1, %v1232_v13, %v3774_v32  ;;  %v1323_v13 = vsel %vm902_vm2, %v1320_v14, %v3795_v49  ;;  %v499_v32 = vrot.slane %v2406_v22, 7  ;;  %v3797_v14 = vrot.slane %v2383_v19, 7 }
  0xe4   :  { %v1296_v27 = vadd.f32 %v1235_v5, %v1184_v39  ;;  %v1383_v39 = vadd.f32 %v1321_v6, %v1295_v16  ;;  %v2841_v19 = vand.u32 2147483647, %v433_v37  ;;  %v1092_v37 = vadd.f32 %v2707_v50, %v2483_v54 }
  0xe5   :  { %1051 = vrot.lane.b32.xlu1 %v2774_v17, %s2231_s10  ;;  %1047 = vrot.lane.b32.xlu0 %v2776_v1, %s2231_s10  ;;  %v493_v21 = vsel %vm204_vm0, %v3797_v14, %v3796_v48  ;;  %v500_v11 = vsel %vm204_vm0, %v3798_v51, %v499_v32 }
  0xe6   :  { %v1384_v5 = vadd.f32 %v1323_v13, %v1296_v27  ;;  %v1639_v13 = vmul.f32 -1.1111112, %v1383_v39  ;;  %v2872_v51 = vadd.f32 %v2727_v9, %v1092_v37 }
  0xe9   :  { %1055 = vrot.lane.b32.xlu1 %v2790_v15, %s2231_s10  ;;  %723 = vrot.lane.b32.xlu0 %v2737_v35, %s2232_s11  ;;  %v496_v35 = vrot.slane %v2392_v20, 7 }
  0xeb   :  { %v598_v44 = vpop.permute.xlu0 %597 }
  0xec   :  { %v669_v40 = vadd.f32 %v598_v44, %v2509_v25  ;;  %v546_v25 = vsub.f32 %v2392_v20, %v496_v35  ;;  %v2843_v44 = vand.u32 2147483647, %v435_v57  ;;  %v1640_v57 = vmul.f32 -1.1111112, %v1384_v5 }
  0xed   :  { %731 = vrot.lane.b32.xlu1 %v2760_v61, %s2232_s11  ;;  %727 = vrot.lane.b32.xlu0 %v2758_v52, %s2232_s11  ;;  %v1091_v61 = vadd.f32 %v2743_v12, %v2461_v45  ;;  %v544_v45 = vsub.f32 %v2378_v18, %v493_v21 }
  0xee   :  { %v2865_v54 = vand.u32 2147483647, %v546_v25  ;;  %v1665_v39 = vmul.f32 1.442695, %v1640_v57 }
  0xef   :  { %v600_v38 = vpop.permute.xlu1 %599  ;;  %v602_v10 = vpop.permute.xlu0 %601  ;;  %v2867_v50 = vand.u32 2147483647, %v544_v45 }
  0xf0   :  { %v670_v49 = vadd.f32 %v600_v38, %v2516_v30  ;;  %v671_v12 = vadd.f32 %v602_v10, %v2511_v28  ;;  %v1663_v10 = vmul.f32 1.442695, %v1639_v13 }
  0xf1   :  { %1147 = vrot.lane.b32.xlu1 %v2774_v17, %s2232_s11  ;;  %1143 = vrot.lane.b32.xlu0 %v2776_v1, %s2232_s11 }
  0xf2   :  { %2110 = vpow2.f32 %v1663_v10 }
  0xf3   :  { %v696_v16 = vpop.permute.xlu1 %695  ;;  %v694_v6 = vpop.permute.xlu0 %693  ;;  %2112 = vpow2.f32 %v1665_v39 }
  0xf4   :  { %v766_v30 = vadd.f32 %v696_v16, %v670_v49  ;;  %v765_v38 = vadd.f32 %v694_v6, %v669_v40  ;;  %v1186_v40 = vadd.f32 %v2719_v31, %v1090_v2  ;;  %v2858_v49 = vadd.f32 %v2768_v7, %v1091_v61 }
  0xf5   :  { %1151 = vrot.lane.b32.xlu1 %v2790_v15, %s2232_s11  ;;  %633 = vrot.lane.b32.xlu0 %v2832_v63, %s2231_s10  ;;  %v548_v7 = vsub.f32 %v2406_v22, %v500_v11 }
  0xf6   :  { %v815_v0 = vrot.slane %v766_v30, 1  ;;  %v814_v27 = vrot.slane %v765_v38, 1  ;;  %v904_v14 = vrot.slane %v766_v30, 2  ;;  %v903_v32 = vrot.slane %v765_v38, 2 }
  0xf7   :  { %v606_v48 = vpop.permute.xlu1 %605  ;;  %v698_v18 = vpop.permute.xlu0 %697  ;;  %v1236_v2 = vrot.slane %v1186_v40, 1  ;;  %v1237_v5 = vrot.slane %v2858_v49, 1  ;;  %v2880_v11 = vand.u32 2147483647, %v548_v7 }
  0xf8   :  { %v816_v21 = vsel %vm813_vm1, %v814_v27, %v815_v0  ;;  %v767_v16 = vadd.f32 %v698_v18, %v671_v12  ;;  %v905_v12 = vsel %vm902_vm2, %v903_v32, %v904_v14  ;;  %v673_v9 = vadd.f32 %v606_v48, %v2524_v34 }
  0xf9   :  { %v878_v28 = vadd.f32 %v816_v21, %v765_v38  ;;  %641 = vrot.lane.b32.xlu1 %v2843_v44, %s2231_s10  ;;  %637 = vrot.lane.b32.xlu0 %v2841_v19, %s2231_s10  ;;  %v1239_v32 = vrot.slane %v2872_v51, 1  ;;  %v3799_v34 = vrot.slane %v2411_v23, 7 }
  0xfa   :  { %v817_v31 = vrot.slane %v767_v16, 1  ;;  %v906_v61 = vrot.slane %v767_v16, 2 }
  0xfb   :  { %v702_v6 = vpop.permute.xlu1 %701  ;;  %v604_v38 = vpop.permute.xlu0 %603  ;;  %v967_v27 = vadd.f32 %v905_v12, %v878_v28  ;;  %v1325_v28 = vrot.slane %v2858_v49, 2  ;;  %v2900_v48 = vsel %vm204_vm0, %v496_v35, %v3799_v34  ;;  %v1327_v12 = vrot.slane %v2872_v51, 2 }
  0xfc   :  { %v818_v25 = vsel %vm813_vm1, %v815_v0, %v817_v31  ;;  %v880_v45 = vadd.f32 %v817_v31, %v767_v16  ;;  %v907_v13 = vsel %vm902_vm2, %v904_v14, %v906_v61  ;;  %v1238_v16 = vsel %vm813_vm1, %v1236_v2, %v1237_v5 }
  0xfd   :  { %v879_v18 = vadd.f32 %v818_v25, %v766_v30  ;;  %1057 = vrot.lane.b32.xlu1 %v2865_v54, %s2231_s10  ;;  %1053 = vrot.lane.b32.xlu0 %v2867_v50, %s2231_s10  ;;  %v1324_v30 = vrot.slane %v1186_v40, 2  ;;  %v1407_v7 = vmul.f32 -1.1111112, %v967_v27  ;;  %v2889_v31 = vadd.f32 %v702_v6, %v673_v9 }
  0xfe   :  { %v969_v57 = vadd.f32 %v906_v61, %v880_v45  ;;  %v672_v61 = vadd.f32 %v604_v38, %v2530_v36  ;;  %v1298_v10 = vadd.f32 %v1238_v16, %v1186_v40  ;;  %v1240_v25 = vsel %vm813_vm1, %v1237_v5, %v1239_v32 }
  0xff   :  { %v968_v37 = vadd.f32 %v907_v13, %v879_v18  ;;  %v2884_v0 = vpop.permute.xlu1 %611  ;;  %v608_v21 = vpop.permute.xlu0 %607  ;;  %v1326_v45 = vsel %vm902_vm2, %v1324_v30, %v1325_v28  ;;  %v547_v18 = vsub.f32 %v2411_v23, %v2900_v48  ;;  %v434_v35 = vsub.f32 %v2392_v20, %v2585_v24 }
 0x100   :  { %v1409_v14 = vmul.f32 -1.1111112, %v969_v57  ;;  %v1431_v13 = vmul.f32 1.442695, %v1407_v7  ;;  %v820_v36 = vrot.slane %v2889_v31, 1  ;;  %v674_v5 = vadd.f32 %v608_v21, %v2538_v42  ;;  %v2924_v7 = vpop.eup %2110 }
 0x101   :  { %1061 = vrot.lane.b32.xlu1 %v2880_v11, %s2231_s10  ;;  %729 = vrot.lane.b32.xlu0 %v2832_v63, %s2232_s11  ;;  %v1408_v6 = vmul.f32 -1.1111112, %v968_v37  ;;  %v3800_v23 = vrot.slane %v2782_v41, 1  ;;  %v1299_v20 = vadd.f32 %v1240_v25, %v2858_v49  ;;  %v1386_v24 = vadd.f32 %v1326_v45, %v1298_v10 }
 0x102   :  { %v1435_v40 = vmul.f32 1.442695, %v1409_v14  ;;  %v1328_v34 = vsel %vm902_vm2, %v1325_v28, %v1327_v12  ;;  %v909_v48 = vrot.slane %v2889_v31, 2  ;;  %v2931_v14 = vpop.eup %2112  ;;  %v436_v49 = vsub.f32 %v2406_v22, %v2593_v29 }
 0x103   :  { %v2903_v39 = vpop.permute.xlu1 %707  ;;  %v700_v2 = vpop.permute.xlu0 %699  ;;  %v1297_v9 = vadd.f32 %v3800_v23, %v2782_v41  ;;  %v1433_v16 = vmul.f32 1.442695, %v1408_v6  ;;  %2114 = vpow2.f32 %v1431_v13  ;;  %v3801_v25 = vrot.slane %v2782_v41, 2 }
 0x104   :  { %v768_v27 = vadd.f32 %v700_v2, %v672_v61  ;;  %v2933_v61 = vand.u32 2147483647, %v434_v35  ;;  %2116 = vpow2.f32 %v1435_v40  ;;  %v1387_v35 = vadd.f32 %v1328_v34, %v1299_v20 }
 0x105   :  { %737 = vrot.lane.b32.xlu1 %v2843_v44, %s2232_s11  ;;  %733 = vrot.lane.b32.xlu0 %v2841_v19, %s2232_s11  ;;  %v1385_v45 = vadd.f32 %v3801_v25, %v1297_v9  ;;  %2118 = vpow2.f32 %v1433_v16  ;;  %v1735_v40 = vrot.slane %v2924_v7, 7  ;;  %v2962_v9 = vand.u32 2147483647, %v436_v49 }
 0x106   :  { %v819_v38 = vrot.slane %v768_v27, 1  ;;  %v908_v57 = vrot.slane %v768_v27, 2  ;;  %v1643_v20 = vmul.f32 -1.1111112, %v1387_v35  ;;  %v2973_v34 = vand.u32 2147483647, %v547_v18 }
 0x107   :  { %v2922_v37 = vpop.permute.xlu1 %1127  ;;  %v704_v30 = vpop.permute.xlu0 %703 }
 0x108   :  { %v821_v42 = vsel %vm813_vm1, %v819_v38, %v820_v36  ;;  %v2929_v21 = vadd.f32 %v704_v30, %v674_v5  ;;  %v910_v28 = vsel %vm902_vm2, %v908_v57, %v909_v48  ;;  %v1736_v5 = vrot.slane %v2931_v14, 7 }
 0x109   :  { %v881_v10 = vadd.f32 %v821_v42, %v768_v27  ;;  %1153 = vrot.lane.b32.xlu1 %v2865_v54, %s2232_s11  ;;  %1149 = vrot.lane.b32.xlu0 %v2867_v50, %s2232_s11  ;;  %v1642_v38 = vmul.f32 -1.1111112, %v1386_v24  ;;  %v1300_v57 = vadd.f32 %v1239_v32, %v2872_v51  ;;  %v676_v24 = vadd.f32 %v2884_v0, %v2540_v43 }
 0x10a   :  { %v822_v2 = vrot.slane %v2929_v21, 1  ;;  %v911_v6 = vrot.slane %v2929_v21, 2  ;;  %v1641_v30 = vmul.f32 -1.1111112, %v1385_v45  ;;  %v1737_v16 = vsel %vm204_vm0, %v1735_v40, %v1736_v5 }
 0x10b   :  { %v970_v22 = vadd.f32 %v910_v28, %v881_v10  ;;  %v2946_v29 = vpop.permute.xlu1 %617  ;;  %v610_v27 = vpop.permute.xlu0 %609  ;;  %v1388_v42 = vadd.f32 %v1327_v12, %v1300_v57  ;;  %v2976_v49 = vadd.f32 %v2903_v39, %v676_v24  ;;  %v17_v28 = vld [vmem:[%s3759_s0 + $0x28] sm:$0xff]  ;;  %v1671_v25 = vmul.f32 1.442695, %v1643_v20 }
 0x10c   :  { %v823_v13 = vsel %vm813_vm1, %v820_v36, %v822_v2  ;;  %v912_v36 = vsel %vm902_vm2, %v909_v48, %v911_v6  ;;  %v1669_v48 = vmul.f32 1.442695, %v1642_v38  ;;  %v675_v0 = vadd.f32 %v610_v27, %v2563_v55 }
 0x10d   :  { %v1410_v23 = vmul.f32 -1.1111112, %v970_v22  ;;  %v882_v41 = vadd.f32 %v823_v13, %v2889_v31  ;;  %1157 = vrot.lane.b32.xlu1 %v2880_v11, %s2232_s11  ;;  %639 = vrot.lane.b32.xlu0 %v2933_v61, %s2231_s10  ;;  %v2985_v18 = vpop.eup %2114  ;;  %v1667_v38 = vmul.f32 1.442695, %v1641_v30  ;;  %v1644_v57 = vmul.f32 -1.1111112, %v1388_v42 }
 0x10e   :  { %v2117_v35 = vpop.eup %2116  ;;  %2120 = vpow2.f32 %v1669_v48  ;;  %v825_v55 = vrot.slane %v2976_v49, 1  ;;  %v914_v20 = vrot.slane %v2976_v49, 2  ;;  %v3777_v30 = vrot.slane %v2985_v18, 7 }
 0x10f   :  { %v971_v51 = vadd.f32 %v912_v36, %v882_v41  ;;  %v2966_v32 = vpop.permute.xlu1 %1033  ;;  %v614_v31 = vpop.permute.xlu0 %613  ;;  %v1437_v10 = vmul.f32 1.442695, %v1410_v23  ;;  %v1093_v36 = vadd.f32 %v2752_v4, %v2496_v58  ;;  %v1673_v58 = vmul.f32 1.442695, %v1644_v57 }
 0x110   :  { %v2989_v13 = vpop.eup %2118  ;;  %v677_v27 = vadd.f32 %v614_v31, %v2576_v62  ;;  %v1506_v62 = vrot.slane %v2117_v35, 7  ;;  %v883_v35 = vadd.f32 %v822_v2, %v2929_v21 }
 0x111   :  { %643 = vrot.lane.b32.xlu0 %v2962_v9, %s2231_s10  ;;  %1777 = vrot.lane.b32.xlu1 %v1737_v16, %s2230_s13  ;;  %v1411_v43 = vmul.f32 -1.1111112, %v971_v51  ;;  %2122 = vpow2.f32 %v1437_v10  ;;  %v1504_v42 = vrot.slane %v2989_v13, 7 }
 0x113   :  { %v2987_v12 = vpop.permute.xlu1 %1037  ;;  %v706_v39 = vpop.permute.xlu0 %705  ;;  %v1439_v45 = vmul.f32 1.442695, %v1411_v43  ;;  %v1094_v43 = vadd.f32 %v2788_v59, %v2479_v53 }
 0x114   :  { %v771_v22 = vadd.f32 %v706_v39, %v675_v0  ;;  %v1189_v0 = vadd.f32 %v2797_v3, %v1093_v36 }
 0x115   :  { %1059 = vrot.lane.b32.xlu0 %v2973_v34, %s2231_s10  ;;  %94 = vrot.lane.b32.xlu1 %v17_v28, %s2230_s13  ;;  %2124 = vpow2.f32 %v1439_v45  ;;  %v1507_v45 = vsel %vm204_vm0, %v1504_v42, %v1506_v62 }
 0x116   :  { %v824_v23 = vrot.slane %v771_v22, 1  ;;  %v913_v41 = vrot.slane %v771_v22, 2  ;;  %2126 = vpow2.f32 %v1671_v25  ;;  %v1241_v57 = vrot.slane %v1189_v0, 1 }
 0x117   :  { %v2999_v24 = vpop.permute.xlu1 %713  ;;  %v710_v51 = vpop.permute.xlu0 %709  ;;  %2128 = vpow2.f32 %v1667_v38 }
 0x118   :  { %v826_v16 = vsel %vm813_vm1, %v824_v23, %v825_v55  ;;  %v773_v48 = vadd.f32 %v710_v51, %v677_v27  ;;  %v915_v4 = vsel %vm902_vm2, %v913_v41, %v914_v20  ;;  %v3027_v53 = vpop.eup %2120  ;;  %2130 = vpow2.f32 %v1673_v58 }
 0x119   :  { %v884_v31 = vadd.f32 %v826_v16, %v771_v22  ;;  %735 = vrot.lane.b32.xlu0 %v2933_v61, %s2232_s11  ;;  %1543 = vrot.lane.b32.xlu1 %v3777_v30, %s2230_s13  ;;  %v1095_v51 = vadd.f32 %v2779_v47, %v2501_v60  ;;  %v972_v58 = vadd.f32 %v911_v6, %v883_v35 }
 0x11a   :  { %v827_v10 = vrot.slane %v773_v48, 1  ;;  %v916_v59 = vrot.slane %v773_v48, 2 }
 0x11b   :  { %v973_v28 = vadd.f32 %v915_v4, %v884_v31  ;;  %v3013_v25 = vpop.permute.xlu1 %1129  ;;  %v1126_v39 = vpop.permute.xlu0 %1125  ;;  %v1329_v4 = vrot.slane %v1189_v0, 2 }
 0x11c   :  { %v828_v22 = vsel %vm813_vm1, %v825_v55, %v827_v10  ;;  %v3022_v38 = vadd.f32 %v1126_v39, %v1094_v43  ;;  %v3029_v3 = vpop.eup %2122  ;;  %v886_v23 = vadd.f32 %v827_v10, %v773_v48  ;;  %v3048_v10 = vadd.f32 %v2922_v37, %v1095_v51 }
 0x11d   :  { %739 = vrot.lane.b32.xlu0 %v2962_v9, %s2232_s11  ;;  %1547 = vrot.lane.b32.xlu1 %v1507_v45, %s2230_s13  ;;  %v1413_v27 = vmul.f32 -1.1111112, %v973_v28  ;;  %v885_v16 = vadd.f32 %v828_v22, %v2976_v49  ;;  %v917_v60 = vsel %vm902_vm2, %v914_v20, %v916_v59  ;;  %v16_v49 = vld [vmem:[%s3759_s0 + $0x20] sm:$0xff]  ;;  %v1508_v39 = vrot.slane %v3029_v3, 7 }
 0x11e   :  { %v1242_v2 = vrot.slane %v3022_v38, 1  ;;  %v1330_v62 = vrot.slane %v3022_v38, 2  ;;  %v975_v21 = vadd.f32 %v916_v59, %v886_v23  ;;  %v1740_v20 = vrot.slane %v3027_v53, 7 }
 0x11f   :  { %v3032_v41 = vpop.permute.xlu1 %1133  ;;  %v616_v55 = vpop.permute.xlu0 %615  ;;  %v1443_v28 = vmul.f32 1.442695, %v1413_v27  ;;  %v974_v22 = vadd.f32 %v917_v60, %v885_v16  ;;  %v1244_v23 = vrot.slane %v3048_v10, 1  ;;  %v679_v16 = vadd.f32 %v2946_v29, %v2566_v56 }
 0x120   :  { %v3034_v36 = vpop.eup %2124  ;;  %v1243_v48 = vsel %vm813_vm1, %v1241_v57, %v1242_v2  ;;  %v1331_v37 = vsel %vm902_vm2, %v1329_v4, %v1330_v62  ;;  %v678_v29 = vadd.f32 %v616_v55, %v2608_v33 }
 0x121   :  { %v3040_v31 = vpop.eup %2126  ;;  %1155 = vrot.lane.b32.xlu0 %v2973_v34, %s2232_s11  ;;  %v1301_v47 = vadd.f32 %v1243_v48, %v1189_v0  ;;  %v3776_v45 = vrot.slane %v3034_v36, 7  ;;  %v1412_v0 = vmul.f32 -1.1111112, %v972_v58  ;;  %2132 = vpow2.f32 %v1443_v28 }
 0x122   :  { %v2129_v43 = vpop.eup %2128  ;;  %v1741_v59 = vrot.slane %v3040_v31, 7  ;;  %v1415_v58 = vmul.f32 -1.1111112, %v975_v21  ;;  %v1414_v30 = vmul.f32 -1.1111112, %v974_v22 }
 0x123   :  { %v3054_v6 = vpop.permute.xlu1 %623  ;;  %v620_v35 = vpop.permute.xlu0 %619  ;;  %v1510_v57 = vsel %vm204_vm0, %v1508_v39, %v3776_v45  ;;  %v1389_v27 = vadd.f32 %v1331_v37, %v1301_v47  ;;  %v1738_v51 = vrot.slane %v2129_v43, 7  ;;  %v1441_v31 = vmul.f32 1.442695, %v1412_v0 }
 0x124   :  { %1551 = vrot.lane.b32.xlu1 %v1510_v57, %s2230_s13  ;;  %v2131_v45 = vpop.eup %2130  ;;  %v3075_v47 = vadd.f32 %v2999_v24, %v679_v16  ;;  %v1742_v43 = vsel %vm204_vm0, %v1740_v20, %v1741_v59  ;;  %v1447_v28 = vmul.f32 1.442695, %v1415_v58  ;;  %v19_v24 = vld [vmem:[%s3759_s0 + $0x38] sm:$0xff]  ;;  %v1445_v37 = vmul.f32 1.442695, %v1414_v30 }
 0x125   :  { %92 = vrot.lane.b32.xlu0 %v16_v49, %s2230_s13  ;;  %v1645_v60 = vmul.f32 -1.1111112, %v1389_v27  ;;  %v1245_v49 = vsel %vm813_vm1, %v1242_v2, %v1244_v23  ;;  %v1739_v7 = vsel %vm204_vm0, %v1736_v5, %v1738_v51  ;;  %v1743_v55 = vrot.slane %v2131_v45, 7 }
 0x126   :  { %v1302_v2 = vadd.f32 %v1245_v49, %v3022_v38  ;;  %v1096_v38 = vadd.f32 %v2966_v32, %v2582_v8  ;;  %v1098_v0 = vadd.f32 %v2987_v12, %v2591_v26  ;;  %v830_v57 = vrot.slane %v3075_v47, 1 }
 0x127   :  { %v3071_v48 = vpop.permute.xlu1 %1039  ;;  %v1036_v4 = vpop.permute.xlu0 %1035  ;;  %v1675_v56 = vmul.f32 1.442695, %v1645_v60  ;;  %v680_v5 = vadd.f32 %v620_v35, %v2620_v46  ;;  %v1303_v30 = vadd.f32 %v1244_v23, %v3048_v10  ;;  %v919_v26 = vrot.slane %v3075_v47, 2 }
 0x128   :  { %1783 = vrot.lane.b32.xlu1 %v1742_v43, %s2230_s13  ;;  %v1192_v46 = vadd.f32 %v3013_v25, %v1096_v38  ;;  %v1744_v58 = vsel %vm204_vm0, %v1741_v59, %v1743_v55  ;;  %v3802_v25 = vld [vmem:[#allocation9_spill] sm:$0xff] }
 0x129   :  { %1775 = vrot.lane.b32.xlu0 %v1735_v40, %s2230_s13  ;;  %2134 = vpow2.f32 %v1675_v56  ;;  %v1332_v40 = vrot.slane %v3048_v10, 2  ;;  %v3119_v10 = vadd.f32 %v3032_v41, %v1098_v0  ;;  %v1097_v43 = vadd.f32 %v1036_v4, %v3802_v25 }
 0x12a   :  { %2136 = vpow2.f32 %v1441_v31  ;;  %v1246_v4 = vrot.slane %v1192_v46, 1 }
 0x12b   :  { %v3086_v21 = vpop.permute.xlu1 %1043  ;;  %v712_v22 = vpop.permute.xlu0 %711  ;;  %v1333_v14 = vsel %vm902_vm2, %v1330_v62, %v1332_v40  ;;  %2138 = vpow2.f32 %v1447_v28  ;;  %v1391_v3 = vadd.f32 %v1332_v40, %v1303_v30  ;;  %v3803_v28 = vrot.slane %v2985_v18, 7 }
 0x12c   :  { %v774_v33 = vadd.f32 %v712_v22, %v678_v29  ;;  %98 = vrot.lane.b32.xlu1 %v19_v24, %s2230_s13  ;;  %v1390_v51 = vadd.f32 %v1333_v14, %v1302_v2  ;;  %2140 = vpow2.f32 %v1445_v37  ;;  %v3111_v62 = vpop.eup %2132  ;;  %v1249_v40 = vrot.slane %v3119_v10, 1 }
 0x12d   :  { %1779 = vrot.lane.b32.xlu0 %v1739_v7, %s2230_s13  ;;  %v1505_v2 = vsel %vm204_vm0, %v3803_v28, %v1504_v42  ;;  %v1647_v14 = vmul.f32 -1.1111112, %v1391_v3 }
 0x12e   :  { %v829_v27 = vrot.slane %v774_v33, 1  ;;  %v918_v45 = vrot.slane %v774_v33, 2  ;;  %v1646_v31 = vmul.f32 -1.1111112, %v1390_v51 }
 0x12f   :  { %v3105_v8 = vpop.permute.xlu1 %719  ;;  %v716_v32 = vpop.permute.xlu0 %715  ;;  %v1679_v3 = vmul.f32 1.442695, %v1647_v14 }
 0x130   :  { %v831_v12 = vsel %vm813_vm1, %v829_v27, %v830_v57  ;;  %v3109_v16 = vadd.f32 %v716_v32, %v680_v5  ;;  %v920_v23 = vsel %vm902_vm2, %v918_v45, %v919_v26  ;;  %1785 = vrot.lane.b32.xlu1 %v1744_v58, %s2230_s13  ;;  %v1677_v42 = vmul.f32 1.442695, %v1646_v31 }
 0x131   :  { %v887_v35 = vadd.f32 %v831_v12, %v774_v33  ;;  %1549 = vrot.lane.b32.xlu0 %v1508_v39, %s2230_s13  ;;  %v1513_v39 = vrot.slane %v3111_v62, 7  ;;  %v1334_v27 = vrot.slane %v1192_v46, 2  ;;  %v1337_v45 = vrot.slane %v3119_v10, 2  ;;  %v3810_v62 = vld [vmem:[#allocation16_spill] sm:$0xff] }
 0x132   :  { %v832_v60 = vrot.slane %v3109_v16, 1  ;;  %v921_v49 = vrot.slane %v3109_v16, 2  ;;  %2142 = vpow2.f32 %v1677_v42 }
 0x133   :  { %v976_v56 = vadd.f32 %v920_v23, %v887_v35  ;;  %v3126_v59 = vpop.permute.xlu1 %1135  ;;  %v1132_v29 = vpop.permute.xlu0 %1131  ;;  %v18_v23 = vld [vmem:[%s3759_s0 + $0x30] sm:$0xff] }
 0x134   :  { %v833_v41 = vsel %vm813_vm1, %v830_v57, %v832_v60  ;;  %v3137_v24 = vpop.eup %2134  ;;  %v1193_v7 = vadd.f32 %v1132_v29, %v1097_v43  ;;  %v922_v55 = vsel %vm902_vm2, %v919_v26, %v921_v49  ;;  %1555 = vrot.lane.b32.xlu1 %v1513_v39, %s2230_s13  ;;  %v1306_v26 = vadd.f32 %v1249_v40, %v3119_v10 }
 0x135   :  { %v888_v22 = vadd.f32 %v833_v41, %v3075_v47  ;;  %1545 = vrot.lane.b32.xlu0 %v1505_v2, %s2230_s13  ;;  %v1416_v33 = vmul.f32 -1.1111112, %v976_v56  ;;  %v1745_v18 = vrot.slane %v3137_v24, 7  ;;  %v2137_v13 = vpop.eup %2136 }
 0x136   :  { %v1247_v47 = vrot.slane %v1193_v7, 1  ;;  %v1335_v38 = vrot.slane %v1193_v7, 2  ;;  %v2139_v5 = vpop.eup %2138  ;;  %v1511_v29 = vrot.slane %v2137_v13, 7 }
 0x137   :  { %v977_v37 = vadd.f32 %v922_v55, %v888_v22  ;;  %v3149_v0 = vpop.permute.xlu1 %1139  ;;  %v622_v57 = vpop.permute.xlu0 %621  ;;  %v1449_v12 = vmul.f32 1.442695, %v1416_v33  ;;  %v1516_v28 = vrot.slane %v2139_v5, 7 }
 0x138   :  { %v1248_v30 = vsel %vm813_vm1, %v1246_v4, %v1247_v47  ;;  %v1250_v51 = vsel %vm813_vm1, %v1247_v47, %v1249_v40  ;;  %v3157_v32 = vpop.eup %2140  ;;  %1787 = vrot.lane.b32.xlu1 %v1745_v18, %s2230_s13  ;;  %v1336_v31 = vsel %vm902_vm2, %v1334_v27, %v1335_v38  ;;  %v1338_v53 = vsel %vm902_vm2, %v1335_v38, %v1337_v45  ;;  %v3804_v40 = vld [vmem:[#allocation7_spill] sm:$0xff] }
 0x139   :  { %1781 = vrot.lane.b32.xlu0 %v1740_v20, %s2230_s13  ;;  %v1304_v35 = vadd.f32 %v1248_v30, %v1192_v46  ;;  %v1305_v58 = vadd.f32 %v1250_v51, %v1193_v7  ;;  %v21_v46 = vld [vmem:[%s3759_s0 + $0x48] sm:$0xff]  ;;  %v1417_v25 = vmul.f32 -1.1111112, %v977_v37  ;;  %v1514_v41 = vrot.slane %v3157_v32, 7  ;;  %v3806_v27 = vld [vmem:[#allocation11_spill] sm:$0xff]  ;;  %v23_v32 = vld [vmem:[%s3759_s0 + $0x58] sm:$0xff] }
 0x13a   :  { %2144 = vpow2.f32 %v1449_v12  ;;  %v1394_v7 = vadd.f32 %v1337_v45, %v1306_v26  ;;  %v682_v33 = vadd.f32 %v3054_v6, %v3804_v40  ;;  %v3805_v37 = vrot.slane %v3034_v36, 7  ;;  %v20_v36 = vld [vmem:[%s3759_s0 + $0x40] sm:$0xff]  ;;  %v3807_v12 = vld [vmem:[#allocation8_spill] sm:$0xff] }
 0x13b   :  { %v3168_v20 = vpop.permute.xlu1 %629  ;;  %v626_v10 = vpop.permute.xlu0 %625  ;;  %v1392_v43 = vadd.f32 %v1336_v31, %v1304_v35  ;;  %v1393_v56 = vadd.f32 %v1338_v53, %v1305_v58  ;;  %v1451_v2 = vmul.f32 1.442695, %v1417_v25  ;;  %v1517_v5 = vsel %vm204_vm0, %v1514_v41, %v1516_v28  ;;  %v3808_v35 = vld [vmem:[#allocation10_spill] sm:$0xff]  ;;  %v3809_v53 = vld [vmem:[#allocation13_spill] sm:$0xff] }
 0x13c   :  { %102 = vrot.lane.b32.xlu1 %v21_v46, %s2230_s13  ;;  %v1512_v47 = vsel %vm204_vm0, %v3805_v37, %v1511_v29  ;;  %v3184_v14 = vadd.f32 %v3105_v8, %v682_v33  ;;  %v889_v6 = vadd.f32 %v832_v60, %v3109_v16  ;;  %v681_v45 = vadd.f32 %v622_v57, %v3806_v27  ;;  %v3201_v60 = vpop.eup %2142 }
 0x13d   :  { %96 = vrot.lane.b32.xlu0 %v18_v23, %s2230_s13  ;;  %v1649_v4 = vmul.f32 -1.1111112, %v1393_v56  ;;  %v1648_v22 = vmul.f32 -1.1111112, %v1392_v43  ;;  %2146 = vpow2.f32 %v1451_v2  ;;  %v1650_v30 = vmul.f32 -1.1111112, %v1394_v7 }
 0x13e   :  { %2148 = vpow2.f32 %v1679_v3  ;;  %v1099_v57 = vadd.f32 %v3071_v48, %v3807_v12  ;;  %v1101_v58 = vadd.f32 %v3086_v21, %v3808_v35  ;;  %v835_v23 = vrot.slane %v3184_v14, 1 }
 0x13f   :  { %v3178_v55 = vpop.permute.xlu1 %1045  ;;  %v1042_v42 = vpop.permute.xlu0 %1041  ;;  %v1683_v13 = vmul.f32 1.442695, %v1649_v4  ;;  %v1681_v38 = vmul.f32 1.442695, %v1648_v22  ;;  %v978_v31 = vadd.f32 %v921_v49, %v889_v6  ;;  %v683_v46 = vadd.f32 %v626_v10, %v3809_v53 }
 0x140   :  { %1559 = vrot.lane.b32.xlu1 %v1517_v5, %s2230_s13  ;;  %v1685_v56 = vmul.f32 1.442695, %v1650_v30  ;;  %v924_v29 = vrot.slane %v3184_v14, 2  ;;  %v1515_v16 = vsel %vm204_vm0, %v1513_v39, %v1514_v41  ;;  %v1746_v49 = vrot.slane %v3201_v60, 7 }
 0x141   :  { %1553 = vrot.lane.b32.xlu0 %v1512_v47, %s2230_s13  ;;  %2150 = vpow2.f32 %v1683_v13  ;;  %v1195_v4 = vadd.f32 %v3126_v59, %v1099_v57  ;;  %v1418_v7 = vmul.f32 -1.1111112, %v978_v31  ;;  %v3228_v40 = vadd.f32 %v3149_v0, %v1101_v58 }
 0x142   :  { %2152 = vpow2.f32 %v1681_v38  ;;  %v1100_v47 = vadd.f32 %v1042_v42, %v3810_v62 }
 0x143   :  { %v3196_v8 = vpop.permute.xlu1 %1049  ;;  %v718_v51 = vpop.permute.xlu0 %717  ;;  %2154 = vpow2.f32 %v1685_v56  ;;  %v1251_v60 = vrot.slane %v1195_v4, 1  ;;  %v1254_v24 = vrot.slane %v3228_v40, 1  ;;  %v1342_v53 = vrot.slane %v3228_v40, 2 }
 0x144   :  { %v777_v26 = vadd.f32 %v718_v51, %v681_v45  ;;  %106 = vrot.lane.b32.xlu1 %v23_v32, %s2230_s13  ;;  %v3216_v21 = vpop.eup %2144  ;;  %v1747_v45 = vsel %vm204_vm0, %v1745_v18, %v1746_v49  ;;  %v3256_v18 = vld [vmem:[%s3759_s0 + $0x50] sm:$0xff] }
 0x145   :  { %100 = vrot.lane.b32.xlu0 %v20_v36, %s2230_s13  ;;  %v1518_v38 = vrot.slane %v3216_v21, 7 }
 0x146   :  { %v834_v25 = vrot.slane %v777_v26, 1  ;;  %v923_v43 = vrot.slane %v777_v26, 2 }
 0x147   :  { %v3214_v48 = vpop.permute.xlu1 %725  ;;  %v722_v3 = vpop.permute.xlu0 %721 }
 0x148   :  { %v836_v28 = vsel %vm813_vm1, %v834_v25, %v835_v23  ;;  %v779_v2 = vadd.f32 %v722_v3, %v683_v46  ;;  %v3223_v10 = vpop.eup %2146  ;;  %v925_v33 = vsel %vm902_vm2, %v923_v43, %v924_v29 }
 0x149   :  { %v890_v22 = vadd.f32 %v836_v28, %v777_v26  ;;  %1557 = vrot.lane.b32.xlu0 %v1515_v16, %s2230_s13  ;;  %v2149_v37 = vpop.eup %2148  ;;  %v1519_v59 = vrot.slane %v3223_v10, 7  ;;  %v1453_v26 = vmul.f32 1.442695, %v1418_v7 }
 0x14a   :  { %v837_v13 = vrot.slane %v779_v2, 1  ;;  %v926_v27 = vrot.slane %v779_v2, 2  ;;  %v1748_v43 = vrot.slane %v2149_v37, 7 }
 0x14b   :  { %v979_v39 = vadd.f32 %v925_v33, %v890_v22  ;;  %v3232_v41 = vpop.permute.xlu1 %1141  ;;  %v1138_v5 = vpop.permute.xlu0 %1137  ;;  %v1520_v51 = vsel %vm204_vm0, %v1518_v38, %v1519_v59 }
 0x14c   :  { %v3236_v6 = vpop.eup %2150  ;;  %v838_v0 = vsel %vm813_vm1, %v835_v23, %v837_v13  ;;  %v1196_v32 = vadd.f32 %v1138_v5, %v1100_v47  ;;  %v892_v12 = vadd.f32 %v837_v13, %v779_v2  ;;  %1563 = vrot.lane.b32.xlu1 %v1520_v51, %s2230_s13  ;;  %v927_v46 = vsel %vm902_vm2, %v924_v29, %v926_v27 }
 0x14d   :  { %v3242_v36 = vpop.eup %2152  ;;  %v1419_v42 = vmul.f32 -1.1111112, %v979_v39  ;;  %v891_v30 = vadd.f32 %v838_v0, %v3184_v14  ;;  %1789 = vrot.lane.b32.xlu0 %v1747_v45, %s2230_s13  ;;  %v1751_v25 = vrot.slane %v3236_v6, 7  ;;  %v1339_v2 = vrot.slane %v1195_v4, 2 }
 0x14e   :  { %v1252_v57 = vrot.slane %v1196_v32, 1  ;;  %v1340_v35 = vrot.slane %v1196_v32, 2  ;;  %v1750_v23 = vrot.slane %v3242_v36, 7  ;;  %v981_v16 = vadd.f32 %v926_v27, %v892_v12  ;;  %v2155_v0 = vpop.eup %2154  ;;  %v3811_v27 = vld [vmem:[#allocation14_spill] sm:$0xff] }
 0x14f   :  { %v1455_v14 = vmul.f32 1.442695, %v1419_v42  ;;  %v3258_v58 = vpop.permute.xlu1 %1145  ;;  %v628_v31 = vpop.permute.xlu0 %627  ;;  %v980_v56 = vadd.f32 %v927_v46, %v891_v30  ;;  %v1749_v39 = vsel %vm204_vm0, %v1746_v49, %v1748_v43  ;;  %v685_v45 = vadd.f32 %v3168_v20, %v3811_v27 }
 0x150   :  { %v1253_v3 = vsel %vm813_vm1, %v1251_v60, %v1252_v57  ;;  %v1255_v28 = vsel %vm813_vm1, %v1252_v57, %v1254_v24  ;;  %v1343_v33 = vsel %vm902_vm2, %v1340_v35, %v1342_v53  ;;  %v1752_v29 = vsel %vm204_vm0, %v1750_v23, %v1751_v25  ;;  %v3812_v57 = vld [vmem:[#allocation19_spill] sm:$0xff] }
 0x151   :  { %2156 = vpow2.f32 %v1455_v14  ;;  %104 = vrot.lane.b32.xlu0 %v3256_v18, %s2230_s13  ;;  %v1307_v22 = vadd.f32 %v1253_v3, %v1195_v4  ;;  %v1308_v7 = vadd.f32 %v1255_v28, %v1196_v32  ;;  %v1341_v62 = vsel %vm902_vm2, %v1339_v2, %v1340_v35  ;;  %1795 = vrot.lane.b32.xlu1 %v1752_v29, %s2230_s13  ;;  %v25_v4 = vld [vmem:[%s3759_s0 + $0x68] sm:$0xff] }
 0x152   :  { %2158 = vpow2.f32 %v1453_v26  ;;  %v1420_v6 = vmul.f32 -1.1111112, %v980_v56  ;;  %v1421_v36 = vmul.f32 -1.1111112, %v981_v16  ;;  %v1309_v42 = vadd.f32 %v1254_v24, %v3228_v40  ;;  %v3813_v28 = vld [vmem:[#allocation18_spill] sm:$0xff] }
 0x153   :  { %v3270_v13 = vpop.permute.xlu1 %635  ;;  %v632_v37 = vpop.permute.xlu0 %631  ;;  %v1396_v47 = vadd.f32 %v1343_v33, %v1308_v7  ;;  %v1395_v5 = vadd.f32 %v1341_v62, %v1307_v22  ;;  %v3286_v60 = vadd.f32 %v3214_v48, %v685_v45  ;;  %v1753_v12 = vrot.slane %v2155_v0, 7  ;;  %v3307_v22 = vld [vmem:[%s3759_s0 + $0x60] sm:$0xff]  ;;  %v3814_v33 = vld [vmem:[#allocation15_spill] sm:$0xff] }
 0x154   :  { %v1457_v26 = vmul.f32 1.442695, %v1420_v6  ;;  %v1459_v14 = vmul.f32 1.442695, %v1421_v36  ;;  %v684_v40 = vadd.f32 %v628_v31, %v3812_v57  ;;  %v1397_v35 = vadd.f32 %v1342_v53, %v1309_v42  ;;  %v3338_v57 = vld [vmem:[%s3759_s0 + $0x70] sm:$0xff] }
 0x155   :  { %1791 = vrot.lane.b32.xlu0 %v1749_v39, %s2230_s13  ;;  %v1652_v30 = vmul.f32 -1.1111112, %v1396_v47  ;;  %v1651_v49 = vmul.f32 -1.1111112, %v1395_v5  ;;  %110 = vrot.lane.b32.xlu1 %v25_v4, %s2230_s13  ;;  %v1754_v43 = vsel %vm204_vm0, %v1751_v25, %v1753_v12  ;;  %v1104_v31 = vadd.f32 %v3196_v8, %v3813_v28 }
 0x156   :  { %2160 = vpow2.f32 %v1457_v26  ;;  %v840_v2 = vrot.slane %v3286_v60, 1  ;;  %v686_v53 = vadd.f32 %v632_v37, %v2758_v52  ;;  %v1653_v7 = vmul.f32 -1.1111112, %v1397_v35 }
 0x157   :  { %v3282_v51 = vpop.permute.xlu1 %1051  ;;  %v1048_v32 = vpop.permute.xlu0 %1047  ;;  %v1687_v20 = vmul.f32 1.442695, %v1651_v49  ;;  %v1689_v46 = vmul.f32 1.442695, %v1652_v30  ;;  %v1102_v29 = vadd.f32 %v3178_v55, %v3814_v33  ;;  %v3319_v39 = vadd.f32 %v3258_v58, %v1104_v31 }
 0x158   :  { %v1103_v0 = vadd.f32 %v1048_v32, %v2776_v1  ;;  %v1691_v30 = vmul.f32 1.442695, %v1653_v7 }
 0x159   :  { %1561 = vrot.lane.b32.xlu0 %v1518_v38, %s2230_s13  ;;  %2162 = vpow2.f32 %v1687_v20  ;;  %1797 = vrot.lane.b32.xlu1 %v1754_v43, %s2230_s13  ;;  %v1198_v6 = vadd.f32 %v3232_v41, %v1102_v29  ;;  %v1259_v12 = vrot.slane %v3319_v39, 1 }
 0x15a   :  { %2164 = vpow2.f32 %v1459_v14 }
 0x15b   :  { %v3292_v24 = vpop.eup %2156  ;;  %v3295_v56 = vpop.permute.xlu1 %1055  ;;  %2166 = vpow2.f32 %v1689_v46  ;;  %v1312_v31 = vadd.f32 %v1259_v12, %v3319_v39 }
 0x15c   :  { %v724_v48 = vpop.permute.xlu0 %723  ;;  %v1523_v21 = vrot.slane %v3292_v24, 7  ;;  %v2159_v38 = vpop.eup %2158  ;;  %2168 = vpow2.f32 %v1691_v30 }
 0x15d   :  { %v780_v3 = vadd.f32 %v724_v48, %v684_v40  ;;  %1793 = vrot.lane.b32.xlu0 %v1750_v23, %s2230_s13  ;;  %v929_v23 = vrot.slane %v3286_v60, 2  ;;  %v1521_v37 = vrot.slane %v2159_v38, 7  ;;  %v1256_v40 = vrot.slane %v1198_v6, 1 }
 0x15e   :  { %1567 = vrot.lane.b32.xlu1 %v1523_v21, %s2230_s13  ;;  %v1347_v38 = vrot.slane %v3319_v39, 2 }
 0x15f   :  { %v839_v25 = vrot.slane %v780_v3, 1  ;;  %v928_v16 = vrot.slane %v780_v3, 2  ;;  %v3311_v8 = vpop.permute.xlu1 %731  ;;  %v1522_v49 = vsel %vm204_vm0, %v1519_v59, %v1521_v37 }
 0x160   :  { %v728_v62 = vpop.permute.xlu0 %727  ;;  %v2161_v42 = vpop.eup %2160  ;;  %v1400_v30 = vadd.f32 %v1347_v38, %v1312_v31 }
 0x161   :  { %v841_v47 = vsel %vm813_vm1, %v839_v25, %v840_v2  ;;  %v782_v52 = vadd.f32 %v728_v62, %v686_v53  ;;  %108 = vrot.lane.b32.xlu0 %v3307_v22, %s2230_s13  ;;  %v930_v55 = vsel %vm902_vm2, %v928_v16, %v929_v23  ;;  %v3355_v16 = vld [vmem:[%s3759_s0 + $0x78] sm:$0xff] }
 0x162   :  { %v893_v4 = vadd.f32 %v841_v47, %v780_v3  ;;  %v1344_v3 = vrot.slane %v1198_v6, 2 }
 0x163   :  { %v842_v5 = vrot.slane %v782_v52, 1  ;;  %v3326_v45 = vpop.permute.xlu1 %1147  ;;  %v2163_v26 = vpop.eup %2162  ;;  %v931_v20 = vrot.slane %v782_v52, 2 }
 0x164   :  { %v982_v27 = vadd.f32 %v930_v55, %v893_v4  ;;  %v1144_v36 = vpop.permute.xlu0 %1143  ;;  %v1755_v32 = vrot.slane %v2163_v26, 7  ;;  %v2165_v48 = vpop.eup %2164 }
 0x165   :  { %v843_v58 = vsel %vm813_vm1, %v840_v2, %v842_v5  ;;  %v1199_v14 = vadd.f32 %v1144_v36, %v1103_v0  ;;  %1565 = vrot.lane.b32.xlu0 %v1522_v49, %s2230_s13  ;;  %v895_v10 = vadd.f32 %v842_v5, %v782_v52  ;;  %v3344_v28 = vpop.eup %2166  ;;  %v932_v2 = vsel %vm902_vm2, %v929_v23, %v931_v20 }
 0x166   :  { %v1422_v1 = vmul.f32 -1.1111112, %v982_v27  ;;  %v894_v41 = vadd.f32 %v843_v58, %v3286_v60  ;;  %1799 = vrot.lane.b32.xlu1 %v1755_v32, %s2230_s13  ;;  %v1524_v60 = vrot.slane %v2161_v42, 7  ;;  %v1526_v4 = vrot.slane %v2165_v48, 7  ;;  %v3815_v58 = vld [vmem:[#allocation20_spill] sm:$0xff] }
 0x167   :  { %v1257_v35 = vrot.slane %v1199_v14, 1  ;;  %v1345_v59 = vrot.slane %v1199_v14, 2  ;;  %v3340_v46 = vpop.permute.xlu1 %1151  ;;  %v984_v47 = vadd.f32 %v931_v20, %v895_v10  ;;  %v688_v49 = vadd.f32 %v3270_v13, %v3815_v58 }
 0x168   :  { %v634_v43 = vpop.permute.xlu0 %633  ;;  %v1461_v7 = vmul.f32 1.442695, %v1422_v1  ;;  %v983_v33 = vadd.f32 %v932_v2, %v894_v41  ;;  %v1525_v0 = vsel %vm204_vm0, %v1523_v21, %v1524_v60  ;;  %v1527_v26 = vsel %vm204_vm0, %v1524_v60, %v1526_v4  ;;  %v3379_v41 = vld [vmem:[%s3759_s0 + $0x88] sm:$0xff] }
 0x169   :  { %v1258_v53 = vsel %vm813_vm1, %v1256_v40, %v1257_v35  ;;  %v1260_v25 = vsel %vm813_vm1, %v1257_v35, %v1259_v12  ;;  %112 = vrot.lane.b32.xlu0 %v3338_v57, %s2230_s13  ;;  %v1346_v52 = vsel %vm902_vm2, %v1344_v3, %v1345_v59  ;;  %v1348_v23 = vsel %vm902_vm2, %v1345_v59, %v1347_v38  ;;  %v2169_v40 = vpop.eup %2168 }
 0x16a   :  { %v1310_v29 = vadd.f32 %v1258_v53, %v1198_v6  ;;  %v1311_v62 = vadd.f32 %v1260_v25, %v1199_v14  ;;  %114 = vrot.lane.b32.xlu1 %v3355_v16, %s2230_s13  ;;  %v1756_v6 = vrot.slane %v3344_v28, 7  ;;  %2170 = vpow2.f32 %v1461_v7 }
 0x16b   :  { %v3359_v37 = vpop.permute.xlu1 %641  ;;  %v1423_v36 = vmul.f32 -1.1111112, %v983_v33  ;;  %v1424_v24 = vmul.f32 -1.1111112, %v984_v47  ;;  %v3382_v10 = vadd.f32 %v3311_v8, %v688_v49  ;;  %v687_v35 = vadd.f32 %v634_v43, %v2832_v63 }
 0x16c   :  { %v638_v39 = vpop.permute.xlu0 %637  ;;  %v1398_v55 = vadd.f32 %v1346_v52, %v1310_v29  ;;  %v1399_v5 = vadd.f32 %v1348_v23, %v1311_v62  ;;  %v1757_v21 = vsel %vm204_vm0, %v1755_v32, %v1756_v6  ;;  %v3388_v32 = vld [vmem:[%s3759_s0 + $0x80] sm:$0xff]  ;;  %v1656_v59 = vmul.f32 -1.1111112, %v1400_v30 }
 0x16d   :  { %1569 = vrot.lane.b32.xlu0 %v1525_v0, %s2230_s13  ;;  %v1463_v1 = vmul.f32 1.442695, %v1423_v36  ;;  %v1465_v38 = vmul.f32 1.442695, %v1424_v24  ;;  %v1105_v8 = vadd.f32 %v3282_v51, %v2774_v17  ;;  %v1107_v63 = vadd.f32 %v3295_v56, %v2790_v15 }
 0x16e   :  { %v1655_v27 = vmul.f32 -1.1111112, %v1399_v5  ;;  %v1654_v42 = vmul.f32 -1.1111112, %v1398_v55  ;;  %1571 = vrot.lane.b32.xlu1 %v1527_v26, %s2230_s13  ;;  %v1758_v43 = vrot.slane %v2169_v40, 7  ;;  %v845_v28 = vrot.slane %v3382_v10, 1 }
 0x16f   :  { %v3371_v12 = vpop.permute.xlu1 %1057  ;;  %v689_v31 = vadd.f32 %v638_v39, %v2841_v19  ;;  %v1697_v25 = vmul.f32 1.442695, %v1656_v59  ;;  %v934_v7 = vrot.slane %v3382_v10, 2  ;;  %v1201_v19 = vadd.f32 %v3326_v45, %v1105_v8 }
 0x170   :  { %v1054_v20 = vpop.permute.xlu0 %1053  ;;  %v1695_v14 = vmul.f32 1.442695, %v1655_v27  ;;  %v1693_v13 = vmul.f32 1.442695, %v1654_v42  ;;  %v1759_v56 = vsel %vm204_vm0, %v1756_v6, %v1758_v43  ;;  %v1203_v47 = vadd.f32 %v3340_v46, %v1107_v63 }
 0x171   :  { %1801 = vrot.lane.b32.xlu0 %v1757_v21, %s2230_s13  ;;  %v1106_v39 = vadd.f32 %v1054_v20, %v2867_v50  ;;  %v1261_v50 = vrot.slane %v1201_v19, 1 }
 0x172   :  { %2172 = vpow2.f32 %v1695_v14  ;;  %118 = vrot.lane.b32.xlu1 %v3379_v41, %s2230_s13  ;;  %v1264_v49 = vrot.slane %v1203_v47, 1  ;;  %v1352_v26 = vrot.slane %v1203_v47, 2 }
 0x173   :  { %v3390_v48 = vpop.permute.xlu1 %1061  ;;  %2174 = vpow2.f32 %v1463_v1 }
 0x174   :  { %v730_v3 = vpop.permute.xlu0 %729  ;;  %2176 = vpow2.f32 %v1693_v13  ;;  %v2171_v17 = vpop.eup %2170 }
 0x175   :  { %v783_v60 = vadd.f32 %v730_v3, %v687_v35  ;;  %116 = vrot.lane.b32.xlu0 %v3388_v32, %s2230_s13  ;;  %2178 = vpow2.f32 %v1465_v38  ;;  %v1528_v5 = vrot.slane %v2171_v17, 7  ;;  %v3433_v17 = vld [vmem:[%s3759_s0 + $0x90] sm:$0xff] }
 0x176   :  { %2180 = vpow2.f32 %v1697_v25 }
 0x177   :  { %v844_v2 = vrot.slane %v783_v60, 1  ;;  %v933_v53 = vrot.slane %v783_v60, 2  ;;  %v3403_v33 = vpop.permute.xlu1 %737 }
 0x178   :  { %v734_v29 = vpop.permute.xlu0 %733 }
 0x179   :  { %v846_v15 = vsel %vm813_vm1, %v844_v2, %v845_v28  ;;  %v785_v51 = vadd.f32 %v734_v29, %v689_v31  ;;  %1803 = vrot.lane.b32.xlu0 %v1759_v56, %s2230_s13  ;;  %v935_v52 = vsel %vm902_vm2, %v933_v53, %v934_v7  ;;  %v1349_v31 = vrot.slane %v1201_v19, 2 }
 0x17a   :  { %v896_v62 = vadd.f32 %v846_v15, %v783_v60  ;;  %v1315_v2 = vadd.f32 %v1264_v49, %v1203_v47 }
 0x17b   :  { %v847_v23 = vrot.slane %v785_v51, 1  ;;  %v3412_v55 = vpop.permute.xlu1 %1153  ;;  %v936_v36 = vrot.slane %v785_v51, 2 }
 0x17c   :  { %v985_v4 = vadd.f32 %v935_v52, %v896_v62  ;;  %v1150_v0 = vpop.permute.xlu0 %1149  ;;  %v3414_v27 = vpop.eup %2172 }
 0x17d   :  { %v848_v6 = vsel %vm813_vm1, %v845_v28, %v847_v23  ;;  %v2175_v42 = vpop.eup %2174  ;;  %v1202_v30 = vadd.f32 %v1150_v0, %v1106_v39  ;;  %1573 = vrot.lane.b32.xlu0 %v1528_v5, %s2230_s13  ;;  %v1761_v13 = vrot.slane %v3414_v27, 7  ;;  %v898_v35 = vadd.f32 %v847_v23, %v785_v51  ;;  %v3440_v23 = vld [vmem:[%s3759_s0 + $0x98] sm:$0xff] }
 0x17e   :  { %v1425_v45 = vmul.f32 -1.1111112, %v985_v4  ;;  %v897_v46 = vadd.f32 %v848_v6, %v3382_v10  ;;  %v2177_v58 = vpop.eup %2176  ;;  %v1529_v20 = vrot.slane %v2175_v42, 7  ;;  %v937_v59 = vsel %vm902_vm2, %v934_v7, %v936_v36 }
 0x17f   :  { %v1262_v14 = vrot.slane %v1202_v30, 1  ;;  %v1350_v21 = vrot.slane %v1202_v30, 2  ;;  %v1158_v1 = vpop.permute.xlu1 %1157  ;;  %v1760_v3 = vrot.slane %v2177_v58, 7  ;;  %v2179_v63 = vpop.eup %2178  ;;  %v987_v15 = vadd.f32 %v936_v36, %v898_v35 }
 0x180   :  { %v1467_v24 = vmul.f32 1.442695, %v1425_v45  ;;  %v640_v40 = vpop.permute.xlu0 %639  ;;  %v1530_v10 = vsel %vm204_vm0, %v1528_v5, %v1529_v20  ;;  %v986_v38 = vadd.f32 %v937_v59, %v897_v46  ;;  %v1531_v62 = vrot.slane %v2179_v63, 7  ;;  %v2181_v47 = vpop.eup %2180 }
 0x181   :  { %1575 = vrot.lane.b32.xlu1 %v1530_v10, %s2230_s13  ;;  %v1263_v60 = vsel %vm813_vm1, %v1261_v50, %v1262_v14  ;;  %v1265_v8 = vsel %vm813_vm1, %v1262_v14, %v1264_v49  ;;  %1805 = vrot.lane.b32.xlu0 %v1760_v3, %s2230_s13  ;;  %v1353_v53 = vsel %vm902_vm2, %v1350_v21, %v1352_v26  ;;  %v1427_v36 = vmul.f32 -1.1111112, %v987_v15 }
 0x182   :  { %2182 = vpow2.f32 %v1467_v24  ;;  %v1313_v43 = vadd.f32 %v1263_v60, %v1201_v19  ;;  %v1314_v28 = vadd.f32 %v1265_v8, %v1202_v30  ;;  %v1762_v25 = vsel %vm204_vm0, %v1760_v3, %v1761_v13  ;;  %v3461_v24 = vld [vmem:[%s3759_s0 + $0xa0] sm:$0xff] }
 0x183   :  { %v3428_v7 = vpop.permute.xlu1 %1777  ;;  %v1351_v56 = vsel %vm902_vm2, %v1349_v31, %v1350_v21  ;;  %v1426_v19 = vmul.f32 -1.1111112, %v986_v38  ;;  %v1403_v4 = vadd.f32 %v1352_v26, %v1315_v2  ;;  %v1110_v5 = vadd.f32 %v3390_v48, %v2880_v11 }
 0x184   :  { %v644_v29 = vpop.permute.xlu0 %643  ;;  %v1402_v51 = vadd.f32 %v1353_v53, %v1314_v28  ;;  %v1401_v39 = vadd.f32 %v1351_v56, %v1313_v43  ;;  %v691_v6 = vadd.f32 %v3359_v37, %v2843_v44  ;;  %v1763_v30 = vrot.slane %v2181_v47, 7 }
 0x185   :  { %1807 = vrot.lane.b32.xlu1 %v1762_v25, %s2230_s13  ;;  %120 = vrot.lane.b32.xlu0 %v3433_v17, %s2230_s13  ;;  %v1469_v27 = vmul.f32 1.442695, %v1426_v19  ;;  %v1532_v58 = vsel %vm204_vm0, %v1529_v20, %v1531_v62  ;;  %v690_v11 = vadd.f32 %v640_v40, %v2933_v61  ;;  %v1659_v48 = vmul.f32 -1.1111112, %v1403_v4 }
 0x186   :  { %v1658_v52 = vmul.f32 -1.1111112, %v1402_v51  ;;  %v1657_v46 = vmul.f32 -1.1111112, %v1401_v39  ;;  %v787_v50 = vadd.f32 %v3403_v33, %v691_v6  ;;  %v3456_v49 = vadd.f32 %v1158_v1, %v1110_v5 }
 0x187   :  { %v3448_v45 = vpop.permute.xlu1 %94  ;;  %2184 = vpow2.f32 %v1469_v27  ;;  %v1471_v20 = vmul.f32 1.442695, %v1427_v36  ;;  %v1764_v14 = vsel %vm204_vm0, %v1761_v13, %v1763_v30  ;;  %v1108_v61 = vadd.f32 %v3371_v12, %v2865_v54 }
 0x188   :  { %v1060_v0 = vpop.permute.xlu0 %1059  ;;  %v1701_v42 = vmul.f32 1.442695, %v1658_v52  ;;  %v1699_v44 = vmul.f32 1.442695, %v1657_v46  ;;  %v850_v40 = vrot.slane %v787_v50, 1  ;;  %v692_v1 = vadd.f32 %v644_v29, %v2962_v9 }
 0x189   :  { %122 = vrot.lane.b32.xlu1 %v3440_v23, %s2230_s13  ;;  %1577 = vrot.lane.b32.xlu0 %v1532_v58, %s2230_s13  ;;  %v1703_v3 = vmul.f32 1.442695, %v1659_v48  ;;  %v939_v13 = vrot.slane %v787_v50, 2  ;;  %v1269_v60 = vrot.slane %v3456_v49, 1  ;;  %v1204_v8 = vadd.f32 %v3412_v55, %v1108_v61 }
 0x18a   :  { %2186 = vpow2.f32 %v1701_v42  ;;  %v1357_v2 = vrot.slane %v3456_v49, 2  ;;  %v1109_v53 = vadd.f32 %v1060_v0, %v2973_v34 }
 0x18b   :  { %2188 = vpow2.f32 %v1699_v44  ;;  %v3468_v35 = vpop.permute.xlu1 %1543  ;;  %v1318_v55 = vadd.f32 %v1269_v60, %v3456_v49  ;;  %v1266_v47 = vrot.slane %v1204_v8, 1 }
 0x18c   :  { %v2183_v37 = vpop.eup %2182  ;;  %v736_v26 = vpop.permute.xlu0 %735  ;;  %2190 = vpow2.f32 %v1471_v20 }
 0x18d   :  { %v786_v33 = vadd.f32 %v736_v26, %v690_v11  ;;  %1809 = vrot.lane.b32.xlu1 %v1764_v14, %s2230_s13  ;;  %v1533_v21 = vrot.slane %v2183_v37, 7  ;;  %124 = vrot.lane.b32.xlu0 %v3461_v24, %s2230_s13  ;;  %2192 = vpow2.f32 %v1703_v3  ;;  %v1354_v11 = vrot.slane %v1204_v8, 2 }
 0x18e   :  { %v1406_v44 = vadd.f32 %v1357_v2, %v1318_v55 }
 0x18f   :  { %v849_v59 = vrot.slane %v786_v33, 1  ;;  %v938_v10 = vrot.slane %v786_v33, 2  ;;  %v3484_v51 = vpop.permute.xlu1 %1547 }
 0x190   :  { %v740_v38 = vpop.permute.xlu0 %739 }
 0x191   :  { %v851_v54 = vsel %vm813_vm1, %v849_v59, %v850_v40  ;;  %v788_v12 = vadd.f32 %v740_v38, %v692_v1  ;;  %1579 = vrot.lane.b32.xlu1 %v1533_v21, %s2230_s13  ;;  %v940_v9 = vsel %vm902_vm2, %v938_v10, %v939_v13  ;;  %v3477_v31 = vpop.eup %2184  ;;  %v3505_v59 = vld [vmem:[%s3759_s0 + $0xa8] sm:$0xff] }
 0x192   :  { %v899_v63 = vadd.f32 %v851_v54, %v786_v33  ;;  %v1534_v19 = vrot.slane %v3477_v31, 7  ;;  %v2207_v31 = vld [vmem:[%s3759_s0] sm:$0xff] }
 0x193   :  { %v852_v43 = vrot.slane %v788_v12, 1  ;;  %v941_v28 = vrot.slane %v788_v12, 2 }
 0x194   :  { %v988_v25 = vadd.f32 %v940_v9, %v899_v63  ;;  %v1156_v29 = vpop.permute.xlu0 %1155  ;;  %v3481_v15 = vpop.eup %2186  ;;  %v1535_v27 = vsel %vm204_vm0, %v1533_v21, %v1534_v19  ;;  %v3515_v63 = vld [vmem:[%s3759_s0 + $0xb0] sm:$0xff] }
 0x195   :  { %v853_v56 = vsel %vm813_vm1, %v850_v40, %v852_v43  ;;  %v901_v62 = vadd.f32 %v852_v43, %v788_v12  ;;  %v1205_v4 = vadd.f32 %v1156_v29, %v1109_v53  ;;  %v2189_v5 = vpop.eup %2188  ;;  %v942_v34 = vsel %vm902_vm2, %v939_v13, %v941_v28  ;;  %1581 = vrot.lane.b32.xlu0 %v1535_v27, %s2230_s13  ;;  %v2206_v43 = vld [vmem:[%s3759_s0 + $0x8] sm:$0xff]  ;;  %v2208_v29 = vld [vmem:[%s3759_s0 + $0x10] sm:$0xff] }
 0x196   :  { %v1428_v52 = vmul.f32 -1.1111112, %v988_v25  ;;  %v900_v39 = vadd.f32 %v853_v56, %v787_v50  ;;  %v1766_v6 = vrot.slane %v3481_v15, 7  ;;  %v3494_v37 = vpop.permute.xlu1 %1551  ;;  %v1765_v48 = vrot.slane %v2189_v5, 7  ;;  %v2191_v14 = vpop.eup %2190 }
 0x197   :  { %v990_v0 = vadd.f32 %v941_v28, %v901_v62  ;;  %v1267_v46 = vrot.slane %v1205_v4, 1  ;;  %v1355_v30 = vrot.slane %v1205_v4, 2  ;;  %v2193_v54 = vpop.eup %2192  ;;  %v1662_v12 = vmul.f32 -1.1111112, %v1406_v44 }
 0x198   :  { %v1473_v36 = vmul.f32 1.442695, %v1428_v52  ;;  %v989_v42 = vadd.f32 %v942_v34, %v900_v39  ;;  %v3492_v58 = vpop.permute.xlu0 %92  ;;  %1811 = vrot.lane.b32.xlu1 %v1765_v48, %s2230_s13  ;;  %v1767_v1 = vsel %vm204_vm0, %v1765_v48, %v1766_v6  ;;  %v1536_v9 = vrot.slane %v2191_v14, 7 }
 0x199   :  { %v1430_v50 = vmul.f32 -1.1111112, %v990_v0  ;;  %v1268_v26 = vsel %vm813_vm1, %v1266_v47, %v1267_v46  ;;  %v1270_v20 = vsel %vm813_vm1, %v1267_v46, %v1269_v60  ;;  %v1356_v21 = vsel %vm902_vm2, %v1354_v11, %v1355_v30  ;;  %1813 = vrot.lane.b32.xlu0 %v1767_v1, %s2230_s13  ;;  %v2211_v11 = vld [vmem:[%s3759_s0 + $0x20] sm:$0xff] }
 0x19a   :  { %2194 = vpow2.f32 %v1473_v36  ;;  %v1429_v49 = vmul.f32 -1.1111112, %v989_v42  ;;  %v1316_v33 = vadd.f32 %v1268_v26, %v1204_v8  ;;  %v1317_v61 = vadd.f32 %v1270_v20, %v1205_v4  ;;  %v3510_v60 = vpop.permute.xlu1 %1783  ;;  %v3544_v42 = vld [vmem:[%s3759_s0 + $0xb8] sm:$0xff] }
 0x19b   :  { %v1358_v40 = vsel %vm902_vm2, %v1355_v30, %v1357_v2  ;;  %v1477_v8 = vmul.f32 1.442695, %v1430_v50  ;;  %v206_v28 = vrot.slane %v2206_v43, 7  ;;  %v205_v2 = vrot.slane %v2207_v31, 7  ;;  %v3552_v30 = vld [vmem:[%s3759_s0 + $0x28] sm:$0xff] }
 0x19c   :  { %v3507_v10 = vpop.permute.xlu0 %1775  ;;  %v1475_v3 = vmul.f32 1.442695, %v1429_v49  ;;  %v1404_v13 = vadd.f32 %v1356_v21, %v1316_v33  ;;  %v1405_v38 = vadd.f32 %v1358_v40, %v1317_v61  ;;  %126 = vrot.lane.b32.xlu1 %v3505_v59, %s2230_s13  ;;  %v208_v15 = vrot.slane %v2208_v29, 7  ;;  %v3816_v49 = vld [vmem:[#allocation5_spill] sm:$0xff]  ;;  %v3817_v21 = vld [vmem:[#allocation12_spill] sm:$0xff] }
 0x19d   :  { %128 = vrot.lane.b32.xlu0 %v3515_v63, %s2230_s13  ;;  %v1709_v52 = vmul.f32 1.442695, %v1662_v12  ;;  %v1537_v39 = vsel %vm204_vm0, %v1534_v19, %v1536_v9  ;;  %v1768_v4 = vrot.slane %v2193_v54, 7  ;;  %v207_v5 = vsel %vm204_vm0, %v205_v2, %v206_v28  ;;  %v2209_v19 = vld [vmem:[%s3759_s0 + $0x18] sm:$0xff] }
 0x19e   :  { %2196 = vpow2.f32 %v1475_v3  ;;  %v1660_v53 = vmul.f32 -1.1111112, %v1404_v13  ;;  %v1661_v25 = vmul.f32 -1.1111112, %v1405_v38  ;;  %v3532_v62 = vpop.permute.xlu1 %98  ;;  %v209_v27 = vsel %vm204_vm0, %v206_v28, %v208_v15  ;;  %v3818_v3 = vld [vmem:[#allocation17_spill] sm:$0xff] }
 0x19f   :  { %2198 = vpow2.f32 %v1477_v8  ;;  %v1769_v0 = vsel %vm204_vm0, %v1766_v6, %v1768_v4  ;;  %v210_v46 = vrot.slane %v2209_v19, 7  ;;  %v213_v6 = vrot.slane %v3552_v30, 7  ;;  %v3819_v4 = vld [vmem:[#allocation6_spill] sm:$0xff] }
 0x1a0   :  { %v3528_v55 = vpop.permute.xlu0 %1779  ;;  %v1707_v56 = vmul.f32 1.442695, %v1661_v25  ;;  %v1705_v47 = vmul.f32 1.442695, %v1660_v53  ;;  %1583 = vrot.lane.b32.xlu1 %v1537_v39, %s2230_s13  ;;  %v211_v44 = vrot.slane %v2211_v11, 7  ;;  %v157_v26 = vsub.f32 %v2206_v43, %v3816_v49  ;;  %v3588_v49 = vld [vmem:[%s3759_s0 + $0x38] sm:$0xff] }
 0x1a1   :  { %1815 = vrot.lane.b32.xlu0 %v1769_v0, %s2230_s13  ;;  %v270_v20 = vsub.f32 %v2206_v43, %v207_v5  ;;  %v269_v14 = vsub.f32 %v2207_v31, %v205_v2  ;;  %v271_v33 = vsub.f32 %v2208_v29, %v209_v27  ;;  %v156_v40 = vsub.f32 %v2207_v31, %v3817_v21 }
 0x1a2   :  { %2200 = vpow2.f32 %v1707_v56  ;;  %v3559_v50 = vpop.permute.xlu1 %1785  ;;  %v158_v13 = vsub.f32 %v2208_v29, %v3818_v3  ;;  %v212_v38 = vsel %vm204_vm0, %v210_v46, %v211_v44  ;;  %v272_v8 = vsub.f32 %v2209_v19, %v210_v46 }
 0x1a3   :  { %2202 = vpow2.f32 %v1705_v47  ;;  %v181_v9 = vand.u32 2147483647, %v157_v26  ;;  %v294_v43 = vand.u32 2147483647, %v270_v20  ;;  %v293_v28 = vand.u32 2147483647, %v269_v14 }
 0x1a4   :  { %v2195_v34 = vpop.eup %2194  ;;  %v3539_v36 = vpop.permute.xlu0 %1549  ;;  %2204 = vpow2.f32 %v1709_v52  ;;  %130 = vrot.lane.b32.xlu1 %v3544_v42, %s2230_s13  ;;  %v214_v2 = vsel %vm204_vm0, %v211_v44, %v213_v6  ;;  %v160_v53 = vsub.f32 %v2211_v11, %v3492_v58  ;;  %v295_v31 = vand.u32 2147483647, %v271_v33 }
 0x1a5   :  { %v1538_v48 = vrot.slane %v2195_v34, 7  ;;  %v180_v15 = vand.u32 2147483647, %v156_v40  ;;  %v273_v56 = vsub.f32 %v2211_v11, %v212_v38  ;;  %v159_v5 = vsub.f32 %v2209_v19, %v3819_v4 }
 0x1a6   :  { %v3569_v54 = vpop.permute.xlu1 %1555  ;;  %v182_v34 = vand.u32 2147483647, %v158_v13  ;;  %v274_v0 = vsub.f32 %v3552_v30, %v214_v2  ;;  %v296_v27 = vand.u32 2147483647, %v272_v8  ;;  %v1848_v58 = vmul.f32 %v3428_v7, %v294_v43 }
 0x1a7   :  { %1585 = vrot.lane.b32.xlu0 %v1538_v48, %s2230_s13  ;;  %v161_v6 = vsub.f32 %v3552_v30, %v3448_v45  ;;  %v1847_v44 = vmul.f32 %v3507_v10, %v293_v28  ;;  %v216_v19 = vrot.slane %v3588_v49, 7  ;;  %v184_v26 = vand.u32 2147483647, %v160_v53 }
 0x1a8   :  { %v3564_v61 = vpop.eup %2196  ;;  %v1546_v1 = vpop.permute.xlu0 %1545  ;;  %v1849_v20 = vmul.f32 %v3528_v55, %v295_v31  ;;  %v1615_v33 = vmul.f32 %v3468_v35, %v180_v15  ;;  %v297_v45 = vand.u32 2147483647, %v273_v56  ;;  %v183_v21 = vand.u32 2147483647, %v159_v5  ;;  %v2213_v55 = vld [vmem:[%s3759_s0 + $0x30] sm:$0xff]  ;;  %v2214_v5 = vld [vmem:[%s3759_s0 + $0x40] sm:$0xff] }
 0x1a9   :  { %v1539_v12 = vrot.slane %v3564_v61, 7  ;;  %v2199_v29 = vpop.eup %2198  ;;  %v1616_v47 = vmul.f32 %v1546_v1, %v181_v9  ;;  %v1617_v40 = vmul.f32 %v3484_v51, %v182_v34  ;;  %v185_v13 = vand.u32 2147483647, %v161_v6 }
 0x1aa   :  { %v3583_v11 = vpop.permute.xlu1 %1787  ;;  %v1541_v61 = vrot.slane %v2199_v29, 7  ;;  %v1871_v38 = vadd.f32 %v1847_v44, %v1615_v33  ;;  %v298_v8 = vand.u32 2147483647, %v274_v0  ;;  %v215_v35 = vrot.slane %v2213_v55, 7 }
 0x1ab   :  { %v1540_v25 = vsel %vm204_vm0, %v1538_v48, %v1539_v12  ;;  %v1872_v30 = vadd.f32 %v1848_v58, %v1616_v47  ;;  %v1619_v9 = vmul.f32 %v3494_v37, %v184_v26  ;;  %v1873_v43 = vadd.f32 %v1849_v20, %v1617_v40 }
 0x1ac   :  { %1587 = vrot.lane.b32.xlu1 %v1540_v25, %s2230_s13  ;;  %v1782_v52 = vpop.permute.xlu0 %1781  ;;  %v2201_v39 = vpop.eup %2200  ;;  %v1618_v51 = vmul.f32 %v3539_v36, %v183_v21  ;;  %v1851_v2 = vmul.f32 %v3510_v60, %v297_v45  ;;  %v1542_v25 = vsel %vm204_vm0, %v1539_v12, %v1541_v61  ;;  %v217_v15 = vsel %vm204_vm0, %v215_v35, %v216_v19 }
 0x1ad   :  { %v2203_v46 = vpop.eup %2202  ;;  %v1771_v48 = vrot.slane %v2201_v39, 7  ;;  %v1850_v1 = vmul.f32 %v1782_v52, %v296_v27  ;;  %v1920_v53 = vrot.slane %v1872_v30, 2  ;;  %v1919_v52 = vrot.slane %v1871_v38, 2 }
 0x1ae   :  { %v1770_v14 = vrot.slane %v2203_v46, 7  ;;  %v2205_v7 = vpop.eup %2204  ;;  %v3603_v31 = vpop.permute.xlu1 %102  ;;  %v1852_v60 = vmul.f32 %v3559_v50, %v298_v8  ;;  %v1875_v39 = vadd.f32 %v1851_v2, %v1619_v9  ;;  %v1922_v4 = vrot.slane %v1873_v43, 2 }
 0x1af   :  { %v1773_v28 = vrot.slane %v2205_v7, 7  ;;  %v1874_v56 = vadd.f32 %v1850_v1, %v1618_v51  ;;  %v275_v12 = vsub.f32 %v2213_v55, %v215_v35  ;;  %v218_v34 = vrot.slane %v2214_v5, 7  ;;  %v2215_v1 = vld [vmem:[%s3759_s0 + $0x48] sm:$0xff] }
 0x1b0   :  { %v97_v10 = vpop.permute.xlu0 %96  ;;  %1817 = vrot.lane.b32.xlu0 %v1770_v14, %s2230_s13  ;;  %v1772_v3 = vsel %vm204_vm0, %v1770_v14, %v1771_v48  ;;  %v1921_v27 = vsel %vm902_vm2, %v1919_v52, %v1920_v53  ;;  %v276_v58 = vsub.f32 %v3588_v49, %v217_v15  ;;  %v163_v6 = vsub.f32 %v3588_v49, %v3532_v62 }
 0x1b1   :  { %1819 = vrot.lane.b32.xlu1 %v1772_v3, %s2230_s13  ;;  %v162_v47 = vsub.f32 %v2213_v55, %v97_v10  ;;  %v1774_v37 = vsel %vm204_vm0, %v1771_v48, %v1773_v28  ;;  %v1924_v50 = vrot.slane %v1874_v56, 2  ;;  %v1923_v48 = vsel %vm902_vm2, %v1920_v53, %v1922_v4 }
 0x1b2   :  { %v1560_v26 = vpop.permute.xlu1 %1559  ;;  %v1925_v20 = vrot.slane %v1875_v39, 2  ;;  %v299_v14 = vand.u32 2147483647, %v275_v12  ;;  %v300_v45 = vand.u32 2147483647, %v276_v58  ;;  %v219_v61 = vsel %vm204_vm0, %v216_v19, %v218_v34 }
 0x1b3   :  { %v186_v44 = vand.u32 2147483647, %v162_v47  ;;  %v187_v30 = vand.u32 2147483647, %v163_v6  ;;  %v220_v3 = vrot.slane %v2215_v1, 7  ;;  %v277_v8 = vsub.f32 %v2214_v5, %v219_v61 }
 0x1b4   :  { %v1554_v29 = vpop.permute.xlu0 %1553  ;;  %1589 = vrot.lane.b32.xlu0 %v1542_v25, %s2230_s13  ;;  %v1926_v62 = vsel %vm902_vm2, %v1924_v50, %v1925_v20  ;;  %v1853_v40 = vmul.f32 %v3583_v11, %v299_v14 }
 0x1b5   :  { %v1620_v36 = vmul.f32 %v1554_v29, %v185_v13  ;;  %1821 = vrot.lane.b32.xlu1 %v1774_v37, %s2230_s13  ;;  %v1621_v10 = vmul.f32 %v3569_v54, %v186_v44  ;;  %v221_v54 = vrot.slane %v3256_v18, 7  ;;  %v301_v28 = vand.u32 2147483647, %v277_v8 }
 0x1b6   :  { %v3629_v21 = vpop.permute.xlu1 %106  ;;  %v278_v37 = vsub.f32 %v2215_v1, %v220_v3 }
 0x1b7   :  { %v1876_v0 = vadd.f32 %v1852_v60, %v1620_v36  ;;  %v1877_v49 = vadd.f32 %v1853_v40, %v1621_v10  ;;  %v222_v43 = vsel %vm204_vm0, %v220_v3, %v221_v54  ;;  %v165_v36 = vsub.f32 %v2215_v1, %v3603_v31  ;;  %v2217_v3 = vld [vmem:[%s3759_s0 + $0x68] sm:$0xff] }
 0x1b8   :  { %v101_v46 = vpop.permute.xlu0 %100  ;;  %1959 = vrot.lane.b32.xlu0 %v1921_v27, %s2232_s11  ;;  %v279_v15 = vsub.f32 %v3256_v18, %v222_v43  ;;  %v302_v6 = vand.u32 2147483647, %v278_v37 }
 0x1b9   :  { %1961 = vrot.lane.b32.xlu1 %v1923_v48, %s2232_s11  ;;  %v1927_v7 = vrot.slane %v1876_v0, 2  ;;  %v164_v55 = vsub.f32 %v2214_v5, %v101_v46  ;;  %v1929_v2 = vrot.slane %v1877_v49, 2  ;;  %v189_v27 = vand.u32 2147483647, %v165_v36 }
 0x1ba   :  { %v303_v34 = vand.u32 2147483647, %v279_v15 }
 0x1bb   :  { %v1928_v13 = vsel %vm902_vm2, %v1925_v20, %v1927_v7  ;;  %v188_v53 = vand.u32 2147483647, %v164_v55 }
 0x1bc   :  { %v1558_v33 = vpop.permute.xlu0 %1557  ;;  %1963 = vrot.lane.b32.xlu0 %v1922_v4, %s2232_s11  ;;  %v2216_v4 = vld [vmem:[%s3759_s0 + $0x58] sm:$0xff] }
 0x1bd   :  { %1965 = vrot.lane.b32.xlu1 %v1926_v62, %s2232_s11  ;;  %v1622_v19 = vmul.f32 %v1558_v33, %v187_v30  ;;  %v1623_v52 = vmul.f32 %v1560_v26, %v188_v53  ;;  %v223_v12 = vrot.slane %v2216_v4, 7  ;;  %v225_v62 = vrot.slane %v3307_v22, 7 }
 0x1be   :  { %v1564_v9 = vpop.permute.xlu1 %1563 }
 0x1bf   :  { %v224_v50 = vsel %vm204_vm0, %v221_v54, %v223_v12  ;;  %v226_v54 = vrot.slane %v2217_v3, 7 }
 0x1c0   :  { %v1790_v38 = vpop.permute.xlu0 %1789  ;;  %1967 = vrot.lane.b32.xlu0 %v1928_v13, %s2232_s11  ;;  %v280_v14 = vsub.f32 %v2216_v4, %v224_v50 }
 0x1c1   :  { %v1854_v35 = vmul.f32 %v1790_v38, %v300_v45  ;;  %1969 = vrot.lane.b32.xlu1 %v1927_v7, %s2232_s11  ;;  %v167_v45 = vsub.f32 %v2216_v4, %v3629_v21  ;;  %v281_v21 = vsub.f32 %v3307_v22, %v225_v62 }
 0x1c2   :  { %v304_v40 = vand.u32 2147483647, %v280_v14 }
 0x1c3   :  { %v1878_v11 = vadd.f32 %v1854_v35, %v1622_v19  ;;  %v1796_v5 = vpop.permute.xlu1 %1795  ;;  %v191_v38 = vand.u32 2147483647, %v167_v45 }
 0x1c4   :  { %v105_v51 = vpop.permute.xlu0 %104  ;;  %v1857_v44 = vmul.f32 %v1796_v5, %v303_v34 }
 0x1c5   :  { %v1930_v25 = vrot.slane %v1878_v11, 2  ;;  %v166_v29 = vsub.f32 %v3256_v18, %v105_v51  ;;  %v228_v51 = vrot.slane %v3338_v57, 7 }
 0x1c7   :  { %v1931_v56 = vsel %vm902_vm2, %v1929_v2, %v1930_v25  ;;  %v190_v60 = vand.u32 2147483647, %v166_v29  ;;  %v111_v48 = vpop.permute.xlu1 %110 }
 0x1c8   :  { %v1792_v47 = vpop.permute.xlu0 %1791  ;;  %1971 = vrot.lane.b32.xlu0 %v1931_v56, %s2232_s11  ;;  %v169_v53 = vsub.f32 %v2217_v3, %v111_v48  ;;  %v230_v48 = vrot.slane %v3355_v16, 7 }
 0x1c9   :  { %v1855_v39 = vmul.f32 %v1792_v47, %v301_v28  ;;  %v1625_v46 = vmul.f32 %v1564_v9, %v190_v60  ;;  %v227_v9 = vsel %vm204_vm0, %v225_v62, %v226_v54  ;;  %v305_v28 = vand.u32 2147483647, %v281_v21 }
 0x1ca   :  { %v282_v15 = vsub.f32 %v2217_v3, %v227_v9  ;;  %v193_v36 = vand.u32 2147483647, %v169_v53  ;;  %v284_v62 = vsub.f32 %v3355_v16, %v230_v48 }
 0x1cb   :  { %v1879_v0 = vadd.f32 %v1855_v39, %v1623_v52  ;;  %v1881_v20 = vadd.f32 %v1857_v44, %v1625_v46  ;;  %v1798_v13 = vpop.permute.xlu1 %1797 }
 0x1cc   :  { %v1562_v18 = vpop.permute.xlu0 %1561  ;;  %v1858_v55 = vmul.f32 %v1798_v13, %v304_v40  ;;  %v306_v39 = vand.u32 2147483647, %v282_v15  ;;  %v233_v13 = vrot.slane %v3379_v41, 7 }
 0x1cd   :  { %v1932_v58 = vrot.slane %v1879_v0, 2  ;;  %v1624_v7 = vmul.f32 %v1562_v18, %v189_v27  ;;  %v1935_v61 = vrot.slane %v1881_v20, 2 }
 0x1cf   :  { %1975 = vrot.lane.b32.xlu0 %v1932_v58, %s2232_s11  ;;  %v1933_v31 = vsel %vm902_vm2, %v1930_v25, %v1932_v58 }
 0x1d0   :  { %v1794_v26 = vpop.permute.xlu0 %1793  ;;  %1973 = vrot.lane.b32.xlu1 %v1933_v31, %s2232_s11  ;;  %v1568_v11 = vpop.permute.xlu1 %1567 }
 0x1d1   :  { %v1856_v33 = vmul.f32 %v1794_v26, %v302_v6  ;;  %v231_v26 = vrot.slane %v3388_v32, 7 }
 0x1d3   :  { %v1880_v30 = vadd.f32 %v1856_v33, %v1624_v7  ;;  %v234_v9 = vsel %vm204_vm0, %v231_v26, %v233_v13 }
 0x1d4   :  { %v109_v10 = vpop.permute.xlu0 %108 }
 0x1d5   :  { %v1934_v1 = vrot.slane %v1880_v30, 2  ;;  %v168_v19 = vsub.f32 %v3307_v22, %v109_v10  ;;  %v229_v22 = vsel %vm204_vm0, %v226_v54, %v228_v51  ;;  %v232_v10 = vsel %vm204_vm0, %v230_v48, %v231_v26 }
 0x1d6   :  { %v283_v5 = vsub.f32 %v3338_v57, %v229_v22  ;;  %v285_v54 = vsub.f32 %v3388_v32, %v232_v10 }
 0x1d7   :  { %v1936_v8 = vsel %vm902_vm2, %v1934_v1, %v1935_v61  ;;  %v192_v25 = vand.u32 2147483647, %v168_v19 }
 0x1d8   :  { %v1566_v49 = vpop.permute.xlu0 %1565  ;;  %1977 = vrot.lane.b32.xlu1 %v1936_v8, %s2232_s11  ;;  %v1800_v56 = vpop.permute.xlu1 %1799  ;;  %v307_v31 = vand.u32 2147483647, %v283_v5  ;;  %v308_v8 = vand.u32 2147483647, %v284_v62  ;;  %v235_v5 = vrot.slane %v3433_v17, 7 }
 0x1d9   :  { %v1626_v35 = vmul.f32 %v1566_v49, %v191_v38  ;;  %v1627_v52 = vmul.f32 %v1568_v11, %v192_v25  ;;  %v1859_v60 = vmul.f32 %v1800_v56, %v305_v28  ;;  %v286_v25 = vsub.f32 %v3379_v41, %v234_v9 }
 0x1db   :  { %v1882_v43 = vadd.f32 %v1858_v55, %v1626_v35  ;;  %v1883_v34 = vadd.f32 %v1859_v60, %v1627_v52  ;;  %v310_v22 = vand.u32 2147483647, %v286_v25 }
 0x1dc   :  { %v113_v2 = vpop.permute.xlu0 %112  ;;  %v115_v4 = vpop.permute.xlu1 %114 }
 0x1dd   :  { %v1937_v29 = vrot.slane %v1882_v43, 2  ;;  %v170_v0 = vsub.f32 %v3338_v57, %v113_v2  ;;  %v1939_v6 = vrot.slane %v1883_v34, 2  ;;  %v171_v45 = vsub.f32 %v3355_v16, %v115_v4 }
 0x1de   :  { %v309_v16 = vand.u32 2147483647, %v285_v54  ;;  %v236_v4 = vrot.slane %v3440_v23, 7 }
 0x1df   :  { %1981 = vrot.lane.b32.xlu1 %v1937_v29, %s2232_s11  ;;  %v1938_v47 = vsel %vm902_vm2, %v1935_v61, %v1937_v29  ;;  %v194_v50 = vand.u32 2147483647, %v170_v0  ;;  %v195_v38 = vand.u32 2147483647, %v171_v45 }
 0x1e0   :  { %v1570_v37 = vpop.permute.xlu0 %1569  ;;  %1979 = vrot.lane.b32.xlu0 %v1938_v47, %s2232_s11  ;;  %v1572_v20 = vpop.permute.xlu1 %1571 }
 0x1e1   :  { %v1628_v18 = vmul.f32 %v1570_v37, %v193_v36  ;;  %v1629_v33 = vmul.f32 %v1572_v20, %v194_v50 }
 0x1e4   :  { %v1802_v12 = vpop.permute.xlu0 %1801  ;;  %v119_v30 = vpop.permute.xlu1 %118 }
 0x1e5   :  { %v1860_v27 = vmul.f32 %v1802_v12, %v306_v39  ;;  %v173_v51 = vsub.f32 %v3379_v41, %v119_v30 }
 0x1e7   :  { %v1884_v46 = vadd.f32 %v1860_v27, %v1628_v18  ;;  %v197_v47 = vand.u32 2147483647, %v173_v51  ;;  %v237_v18 = vsel %vm204_vm0, %v235_v5, %v236_v4 }
 0x1e8   :  { %v117_v58 = vpop.permute.xlu0 %116 }
 0x1e9   :  { %v1940_v44 = vrot.slane %v1884_v46, 2  ;;  %v172_v1 = vsub.f32 %v3388_v32, %v117_v58  ;;  %v287_v46 = vsub.f32 %v3433_v17, %v235_v5 }
 0x1eb   :  { %v1941_v14 = vsel %vm902_vm2, %v1939_v6, %v1940_v44  ;;  %v196_v55 = vand.u32 2147483647, %v172_v1  ;;  %v238_v6 = vrot.slane %v3461_v24, 7  ;;  %v311_v20 = vand.u32 2147483647, %v287_v46 }
 0x1ec   :  { %v1804_v7 = vpop.permute.xlu0 %1803  ;;  %1983 = vrot.lane.b32.xlu0 %v1941_v14, %s2232_s11 }
 0x1ed   :  { %v1861_v57 = vmul.f32 %v1804_v7, %v307_v31 }
 0x1ef   :  { %v1885_v61 = vadd.f32 %v1861_v57, %v1629_v33 }
 0x1f0   :  { %v1574_v40 = vpop.permute.xlu0 %1573 }
 0x1f1   :  { %v1942_v3 = vrot.slane %v1885_v61, 2  ;;  %v1630_v35 = vmul.f32 %v1574_v40, %v195_v38 }
 0x1f3   :  { %1987 = vrot.lane.b32.xlu0 %v1942_v3, %s2232_s11  ;;  %v1943_v49 = vsel %vm902_vm2, %v1940_v44, %v1942_v3  ;;  %v1576_v21 = vpop.permute.xlu1 %1575  ;;  %v288_v44 = vsub.f32 %v3440_v23, %v237_v18 }
 0x1f4   :  { %1985 = vrot.lane.b32.xlu1 %v1943_v49, %s2232_s11  ;;  %v1806_v19 = vpop.permute.xlu0 %1805  ;;  %v1631_v28 = vmul.f32 %v1576_v21, %v196_v55  ;;  %v241_v55 = vrot.slane %v3515_v63, 7 }
 0x1f5   :  { %v1862_v11 = vmul.f32 %v1806_v19, %v308_v8  ;;  %v312_v7 = vand.u32 2147483647, %v288_v44 }
 0x1f7   :  { %v1808_v43 = vpop.permute.xlu1 %1807  ;;  %v1886_v32 = vadd.f32 %v1862_v11, %v1630_v35  ;;  %v240_v35 = vrot.slane %v3505_v59, 7 }
 0x1f8   :  { %v1863_v2 = vmul.f32 %v1808_v43, %v309_v16  ;;  %v121_v53 = vpop.permute.xlu0 %120  ;;  %v243_v43 = vrot.slane %v3544_v42, 7 }
 0x1f9   :  { %v1944_v15 = vrot.slane %v1886_v32, 2  ;;  %v174_v27 = vsub.f32 %v3433_v17, %v121_v53  ;;  %v239_v17 = vsel %vm204_vm0, %v236_v4, %v238_v6  ;;  %v242_v51 = vsel %vm204_vm0, %v240_v35, %v241_v55 }
 0x1fa   :  { %v1887_v29 = vadd.f32 %v1863_v2, %v1631_v28  ;;  %v289_v10 = vsub.f32 %v3461_v24, %v239_v17  ;;  %v290_v2 = vsub.f32 %v3505_v59, %v240_v35  ;;  %v291_v53 = vsub.f32 %v3515_v63, %v242_v51 }
 0x1fb   :  { %v123_v56 = vpop.permute.xlu1 %122  ;;  %v198_v48 = vand.u32 2147483647, %v174_v27 }
 0x1fc   :  { %v1945_v37 = vrot.slane %v1887_v29, 2  ;;  %v1578_v36 = vpop.permute.xlu0 %1577  ;;  %v175_v50 = vsub.f32 %v3440_v23, %v123_v56  ;;  %v313_v49 = vand.u32 2147483647, %v289_v10  ;;  %v244_v56 = vsel %vm204_vm0, %v241_v55, %v243_v43 }
 0x1fd   :  { %v1632_v52 = vmul.f32 %v1578_v36, %v197_v47  ;;  %v315_v36 = vand.u32 2147483647, %v291_v53 }
 0x1fe   :  { %v1946_v60 = vsel %vm902_vm2, %v1944_v15, %v1945_v37  ;;  %v199_v14 = vand.u32 2147483647, %v175_v50 }
 0x1ff   :  { %v1810_v39 = vpop.permute.xlu1 %1809  ;;  %1989 = vrot.lane.b32.xlu1 %v1946_v60, %s2232_s11 }
 0x200   :  { %v1864_v12 = vmul.f32 %v1810_v39, %v310_v22  ;;  %v125_v41 = vpop.permute.xlu0 %124  ;;  %v314_v22 = vand.u32 2147483647, %v290_v2 }
 0x201   :  { %v176_v62 = vsub.f32 %v3461_v24, %v125_v41 }
 0x202   :  { %v1888_v34 = vadd.f32 %v1864_v12, %v1632_v52  ;;  %v292_v52 = vsub.f32 %v3544_v42, %v244_v56 }
 0x203   :  { %v1580_v31 = vpop.permute.xlu1 %1579  ;;  %v200_v38 = vand.u32 2147483647, %v176_v62 }
 0x204   :  { %v1947_v0 = vrot.slane %v1888_v34, 2  ;;  %v1633_v57 = vmul.f32 %v1580_v31, %v198_v48  ;;  %v316_v18 = vand.u32 2147483647, %v292_v52 }
 0x206   :  { %1993 = vrot.lane.b32.xlu1 %v1947_v0, %s2232_s11  ;;  %v1948_v58 = vsel %vm902_vm2, %v1945_v37, %v1947_v0 }
 0x207   :  { %1991 = vrot.lane.b32.xlu0 %v1948_v58, %s2232_s11  ;;  %v1582_v26 = vpop.permute.xlu0 %1581 }
 0x208   :  { %v1634_v61 = vmul.f32 %v1582_v26, %v199_v14 }
 0x20a   :  { %v1812_v33 = vpop.permute.xlu1 %1811 }
 0x20b   :  { %v1865_v45 = vmul.f32 %v1812_v33, %v311_v20  ;;  %v1814_v30 = vpop.permute.xlu0 %1813 }
 0x20c   :  { %v1866_v1 = vmul.f32 %v1814_v30, %v312_v7 }
 0x20d   :  { %v1889_v40 = vadd.f32 %v1865_v45, %v1633_v57 }
 0x20e   :  { %v127_v23 = vpop.permute.xlu1 %126  ;;  %v1890_v54 = vadd.f32 %v1866_v1, %v1634_v61 }
 0x20f   :  { %v1949_v3 = vrot.slane %v1889_v40, 2  ;;  %v129_v13 = vpop.permute.xlu0 %128  ;;  %v177_v25 = vsub.f32 %v3505_v59, %v127_v23 }
 0x210   :  { %v1950_v8 = vrot.slane %v1890_v54, 2  ;;  %v178_v47 = vsub.f32 %v3515_v63, %v129_v13 }
 0x211   :  { %v201_v60 = vand.u32 2147483647, %v177_v25 }
 0x212   :  { %v1584_v21 = vpop.permute.xlu1 %1583  ;;  %v1951_v19 = vsel %vm902_vm2, %v1949_v3, %v1950_v8  ;;  %v202_v59 = vand.u32 2147483647, %v178_v47 }
 0x213   :  { %v1635_v16 = vmul.f32 %v1584_v21, %v200_v38  ;;  %v1816_v11 = vpop.permute.xlu0 %1815  ;;  %1995 = vrot.lane.b32.xlu0 %v1951_v19, %s2232_s11 }
 0x214   :  { %v1867_v24 = vmul.f32 %v1816_v11, %v313_v49 }
 0x216   :  { %v131_v9 = vpop.permute.xlu1 %130  ;;  %v1891_v32 = vadd.f32 %v1867_v24, %v1635_v16 }
 0x217   :  { %v179_v39 = vsub.f32 %v3544_v42, %v131_v9 }
 0x218   :  { %v1952_v28 = vrot.slane %v1891_v32, 2 }
 0x219   :  { %v1586_v37 = vpop.permute.xlu0 %1585  ;;  %v203_v27 = vand.u32 2147483647, %v179_v39 }
 0x21a   :  { %1999 = vrot.lane.b32.xlu0 %v1952_v28, %s2232_s11  ;;  %v1953_v29 = vsel %vm902_vm2, %v1950_v8, %v1952_v28  ;;  %v1636_v12 = vmul.f32 %v1586_v37, %v201_v60 }
 0x21b   :  { %1997 = vrot.lane.b32.xlu1 %v1953_v29, %s2232_s11 }
 0x21e   :  { %v1588_v15 = vpop.permute.xlu1 %1587 }
 0x21f   :  { %v1637_v41 = vmul.f32 %v1588_v15, %v202_v59 }
 0x222   :  { %v1818_v4 = vpop.permute.xlu0 %1817 }
 0x223   :  { %v1868_v5 = vmul.f32 %v1818_v4, %v314_v22  ;;  %v1820_v34 = vpop.permute.xlu1 %1819 }
 0x224   :  { %v1869_v0 = vmul.f32 %v1820_v34, %v315_v36 }
 0x225   :  { %v1892_v63 = vadd.f32 %v1868_v5, %v1636_v12 }
 0x226   :  { %v1893_v46 = vadd.f32 %v1869_v0, %v1637_v41  ;;  %v1590_v58 = vpop.permute.xlu0 %1589 }
 0x227   :  { %v1954_v6 = vrot.slane %v1892_v63, 2  ;;  %v1638_v50 = vmul.f32 %v1590_v58, %v203_v27  ;;  %v1822_v44 = vpop.permute.xlu1 %1821 }
 0x228   :  { %v1955_v31 = vrot.slane %v1893_v46, 2  ;;  %v1870_v48 = vmul.f32 %v1822_v44, %v316_v18 }
 0x22a   :  { %v1894_v26 = vadd.f32 %v1870_v48, %v1638_v50  ;;  %v1956_v42 = vsel %vm902_vm2, %v1954_v6, %v1955_v31  ;;  %v1960_v7 = vpop.permute.xlu0 %1959 }
 0x22b   :  { %2001 = vrot.lane.b32.xlu1 %v1956_v42, %s2232_s11  ;;  %v1962_v17 = vpop.permute.xlu1 %1961  ;;  %v2032_v33 = vsel %vm2031_vm3, %v1960_v7, 0.0 }
 0x22c   :  { %v1957_v20 = vrot.slane %v1894_v26, 2  ;;  %v2033_v57 = vsel %vm2031_vm3, %v1962_v17, 0.0 }
 0x22d   :  { %v2034_v30 = vadd.f32 %v2033_v57, %v2032_v33 }
 0x22e   :  { %v1958_v14 = vsel %vm902_vm2, %v1955_v31, %v1957_v20  ;;  %v1964_v45 = vpop.permute.xlu0 %1963 }
 0x22f   :  { %2005 = vrot.lane.b32.xlu1 %v1957_v20, %s2232_s11  ;;  %2003 = vrot.lane.b32.xlu0 %v1958_v14, %s2232_s11  ;;  %v2036_v10 = vsel %vm2035_vm4, %v1964_v45, 0.0  ;;  %v1966_v62 = vpop.permute.xlu1 %1965 }
 0x230   :  { %v2037_v61 = vadd.f32 %v2036_v10, %v2034_v30  ;;  %v2038_v40 = vsel %vm2031_vm3, %v1966_v62, 0.0 }
 0x232   :  { %v1968_v1 = vpop.permute.xlu0 %1967  ;;  %v2039_v23 = vadd.f32 %v2038_v40, %v2037_v61 }
 0x233   :  { %v2040_v3 = vsel %vm2031_vm3, %v1968_v1, 0.0  ;;  %v1970_v54 = vpop.permute.xlu1 %1969 }
 0x234   :  { %v2041_v13 = vadd.f32 %v2040_v3, %v2039_v23  ;;  %v2042_v8 = vsel %vm2035_vm4, %v1970_v54, 0.0 }
 0x236   :  { %v2043_v55 = vadd.f32 %v2042_v8, %v2041_v13 }
 0x23a   :  { %v1972_v38 = vpop.permute.xlu0 %1971 }
 0x23b   :  { %v2044_v21 = vsel %vm2031_vm3, %v1972_v38, 0.0 }
 0x23c   :  { %v2045_v19 = vadd.f32 %v2044_v21, %v2043_v55 }
 0x241   :  { %v1976_v35 = vpop.permute.xlu0 %1975 }
 0x242   :  { %v1974_v49 = vpop.permute.xlu1 %1973  ;;  %v2048_v43 = vsel %vm2035_vm4, %v1976_v35, 0.0 }
 0x243   :  { %v2046_v16 = vsel %vm2031_vm3, %v1974_v49, 0.0 }
 0x244   :  { %v2047_v11 = vadd.f32 %v2046_v16, %v2045_v19 }
 0x246   :  { %v2049_v51 = vadd.f32 %v2048_v43, %v2047_v11 }
 0x24a   :  { %v1978_v24 = vpop.permute.xlu1 %1977 }
 0x24b   :  { %v2050_v32 = vsel %vm2031_vm3, %v1978_v24, 0.0 }
 0x24c   :  { %v2051_v2 = vadd.f32 %v2050_v32, %v2049_v51 }
 0x251   :  { %v1982_v53 = vpop.permute.xlu1 %1981 }
 0x252   :  { %v1980_v9 = vpop.permute.xlu0 %1979  ;;  %v2054_v56 = vsel %vm2035_vm4, %v1982_v53, 0.0 }
 0x253   :  { %v2052_v28 = vsel %vm2031_vm3, %v1980_v9, 0.0 }
 0x254   :  { %v2053_v25 = vadd.f32 %v2052_v28, %v2051_v2 }
 0x256   :  { %v2055_v37 = vadd.f32 %v2054_v56, %v2053_v25 }
 0x25e   :  { %v1984_v29 = vpop.permute.xlu0 %1983 }
 0x25f   :  { %v2056_v47 = vsel %vm2031_vm3, %v1984_v29, 0.0 }
 0x260   :  { %v2057_v36 = vadd.f32 %v2056_v47, %v2055_v37 }
 0x265   :  { %v1988_v52 = vpop.permute.xlu0 %1987 }
 0x266   :  { %v1986_v15 = vpop.permute.xlu1 %1985  ;;  %v2060_v4 = vsel %vm2035_vm4, %v1988_v52, 0.0 }
 0x267   :  { %v2058_v22 = vsel %vm2031_vm3, %v1986_v15, 0.0 }
 0x268   :  { %v2059_v60 = vadd.f32 %v2058_v22, %v2057_v36 }
 0x26a   :  { %v2061_v5 = vadd.f32 %v2060_v4, %v2059_v60 }
 0x271   :  { %v1990_v39 = vpop.permute.xlu1 %1989 }
 0x272   :  { %v2062_v12 = vsel %vm2031_vm3, %v1990_v39, 0.0 }
 0x273   :  { %v2063_v41 = vadd.f32 %v2062_v12, %v2061_v5 }
 0x278   :  { %v1994_v0 = vpop.permute.xlu1 %1993 }
 0x279   :  { %v1992_v59 = vpop.permute.xlu0 %1991  ;;  %v2066_v46 = vsel %vm2035_vm4, %v1994_v0, 0.0 }
 0x27a   :  { %v2064_v34 = vsel %vm2031_vm3, %v1992_v59, 0.0 }
 0x27b   :  { %v2065_v18 = vadd.f32 %v2064_v34, %v2063_v41 }
 0x27d   :  { %v2067_v6 = vadd.f32 %v2066_v46, %v2065_v18 }
 0x285   :  { %v1996_v27 = vpop.permute.xlu0 %1995 }
 0x286   :  { %v2068_v58 = vsel %vm2031_vm3, %v1996_v27, 0.0 }
 0x287   :  { %v2069_v44 = vadd.f32 %v2068_v58, %v2067_v6 }
 0x28c   :  { %v2000_v31 = vpop.permute.xlu0 %1999 }
 0x28d   :  { %v1998_v63 = vpop.permute.xlu1 %1997  ;;  %v2072_v42 = vsel %vm2035_vm4, %v2000_v31, 0.0 }
 0x28e   :  { %v2070_v50 = vsel %vm2031_vm3, %v1998_v63, 0.0 }
 0x28f   :  { %v2071_v48 = vadd.f32 %v2070_v50, %v2069_v44 }
 0x291   :  { %v2073_v14 = vadd.f32 %v2072_v42, %v2071_v48 }
 0x29d   :  { %v2002_v26 = vpop.permute.xlu1 %2001 }
 0x29e   :  { %v2074_v20 = vsel %vm2031_vm3, %v2002_v26, 0.0 }
 0x29f   :  { %v2075_v7 = vadd.f32 %v2074_v20, %v2073_v14 }
 0x2a1   :  { %v2006_v17 = vpop.permute.xlu1 %2005  ;;  %v2004_v33 = vpop.permute.xlu0 %2003 }
 0x2a2   :  { %v2076_v57 = vsel %vm2031_vm3, %v2004_v33, 0.0  ;;  %v2078_v30 = vsel %vm2035_vm4, %v2006_v17, 0.0 }
 0x2a3   :  { %v2077_v45 = vadd.f32 %v2076_v57, %v2075_v7 }
 0x2a5   :  { %v2079_v10 = vadd.f32 %v2078_v30, %v2077_v45 }
 0x2a7   :  { %2080 = vadd.xlane.f32.xlu0 %v2079_v10 }
 0x334   :  { %v2081_v62 = vpop.xlane.xlu0 %2080 }
 0x335   :  { %v2082_v61 = vrot.slane %v2081_v62, 4 }
 0x337   :  { %v2083_v40 = vadd.f32 %v2082_v61, %v2081_v62 }
 0x339   :  { %v2084_v1 = vrot.slane %v2083_v40, 2 }
 0x33b   :  { %v2085_v23 = vadd.f32 %v2084_v1, %v2083_v40 }
 0x33d   :  { %v2086_v3 = vrot.slane %v2085_v23, 1 }
 0x33f   :  { %v2087_v54 = vadd.f32 %v2086_v3, %v2085_v23 }
 0x341   :  { %2104 = vpush %v2087_v54 }
 0x372   :  { %s2105_s0 = spop %2104 }
 0x373   :  { %2090 = sst [smem:[#allocation2]] %s2105_s0 }
 0x374   :  { %2227 = shalt.err (!%p2224_p2)
}
 0x375   :  { %s2233_s28 = smov [#allocation2]  }
 0x376   :  { %2098 = dma.smem_to_hbm %s2233_s28, 16, %s3761_s2, [#allocation3]  }
 0x377   :  { %2228 = dma.done.wait [#allocation3], 16  }
 0x378   :  { %2229 = vsyncadd [#allocation3], 4294967280 }
 0x379   :  { %2102 = sfence }
 0x37a   :  { %2103 = vsyncpa [#allocation3], 1 }

</bundles_post_ra>
